<compile_context>
chip_gen: v7x
topology: tpu7x:2x2x1
jax: 0.10.0
libtpu: 0.0.40
codegen_flags: <defaults>
</compile_context>

<pallas_src>
import functools
import math

import jax
import jax.numpy as jnp
from jax.experimental import pallas as pl
from jax.experimental.pallas import tpu as pltpu  # noqa: F401  (TPU backend)

# ----------------------------- model config (small, consistent w/ module) ----
B = 2            # batch
C = 8            # feature-map channels ("channels" arg of EfficientViT)
FH = FW = 4      # feature-map spatial size from extract_features
PATCH = 2        # patch_size
IMAGE_SIZE = 8   # defines pos_embedding length: (IMAGE_SIZE//PATCH)**2 + 1
DIM = 32         # dim
DEPTH = 2        # depth
HEADS = 2        # heads
DIM_HEAD = 8     # dim_head
INNER = HEADS * DIM_HEAD
MLP_DIM = 64     # mlp_dim
NUM_CLASSES = 1
PATCH_DIM = C * PATCH * PATCH
LN_EPS = 1e-5

NT_PAD = 8       # padded tokens per batch element (n_tok=5 -> 8, sublane tile)
WA_COLS = 128    # lane-padded width of the per-layer "wide" weight blob
HEAD_ROWS = 40   # sublane-padded rows of the mlp_head blob


# ----------------------------- fused Pallas kernel ----------------------------


def _evit_fused_kernel(
    patches_ref,   # (B*NT_PAD, PATCH_DIM)   rows padded per-batch (row0=cls slot)
    emb_ref,       # (DIM + B*NT_PAD, DIM)   [0:DIM]=patch_w, rest = token bias
    wA_ref,        # (DEPTH, DIM, WA_COLS)   [:,:,0:3I]=qkv_w (Q pre-scaled), [:,:,3I:3I+MLP]=ff_w1
    wB_ref,        # (DEPTH, INNER+MLP, DIM) rows [0:I]=out_w, [I:]=ff_w2
    vecs_ref,      # (DEPTH, 8, MLP_DIM)     rows: ln1_g,ln1_b,ln2_g,ln2_b,out_b,ff_b2,ff_b1,pad
    head_ref,      # (HEAD_ROWS, MLP_DIM)    rows [0:DIM]=head_w1, DIM=head_b1, DIM+1=head_w2^T, DIM+2=head_b2
    o_ref,         # (B, NUM_CLASSES)
    *, batch, n_patch, depth, heads, dim_head, dim, inner, mlp_dim, n_tok_pad):
  f32 = jnp.float32
  n_tok = n_patch + 1
  rows = batch * n_tok_pad

  def layernorm(x, g, b):
    mu = jnp.mean(x, axis=-1, keepdims=True)
    var = jnp.mean(jnp.square(x - mu), axis=-1, keepdims=True)
    return (x - mu) * jax.lax.rsqrt(var + LN_EPS) * g + b

  # ---- prologue: patch embedding + cls token + pos embedding (pre-folded) ---
  emb = emb_ref[...]
  patch_w = emb[0:dim, :]                         # (dim, dim)
  tok_bias = emb[dim:dim + rows, :]               # (rows, dim) cls/pos/patch_b folded
  x = jnp.dot(patches_ref[...], patch_w,
              preferred_element_type=f32) + tok_bias          # (rows, dim)
  # (emb_dropout: identity in inference; pad rows are exactly zero-biased)

  # additive mask: pad key columns (>= n_tok) never receive attention weight
  key_mask = jnp.where(
      jax.lax.broadcasted_iota(jnp.int32, (1, n_tok_pad), 1) < n_tok,
      0.0, -1e30).astype(f32)                     # (1, n_tok_pad)

  # ---- transformer layers (unrolled, activation stays in registers) ---------
  for d in range(depth):
    vec = vecs_ref[d]                             # (8, mlp_dim)
    g1, b1 = vec[0:1, 0:dim], vec[1:2, 0:dim]
    g2, b2 = vec[2:3, 0:dim], vec[3:4, 0:dim]
    out_b, ff_b2 = vec[4:5, 0:dim], vec[5:6, 0:dim]
    ff_b1 = vec[6:7, :]                           # (1, mlp_dim)

    wa = wA_ref[d]                                # (dim, WA_COLS)
    qkv_w = wa[:, 0:3 * inner]                    # (dim, 3*inner) Q pre-scaled
    ff_w1 = wa[:, 3 * inner:3 * inner + mlp_dim]  # (dim, mlp_dim)
    wb = wB_ref[d]                                # (inner+mlp_dim, dim)
    out_w = wb[0:inner, :]                        # (inner, dim)
    ff_w2 = wb[inner:inner + mlp_dim, :]          # (mlp_dim, dim)

    # Residual(PreNorm(Attention)) — batched over the batch dim per head
    xn = layernorm(x, g1, b1)
    qkv = jnp.dot(xn, qkv_w, preferred_element_type=f32)      # (rows, 3*inner)
    qkv3 = qkv.reshape(batch, n_tok_pad, 3 * inner)
    o_heads = []
    for h in range(heads):
      c0 = h * dim_head
      qh = qkv3[:, :, c0:c0 + dim_head]                       # (B, T, dh)
      kh = qkv3[:, :, inner + c0:inner + c0 + dim_head]
      vh = qkv3[:, :, 2 * inner + c0:2 * inner + c0 + dim_head]
      dots = jnp.einsum('bqd,bkd->bqk', qh, kh,
                        preferred_element_type=f32)           # (B, T, T)
      dots = dots + key_mask
      dots = dots - jnp.max(dots, axis=-1, keepdims=True)
      e = jnp.exp(dots)
      attn = e / jnp.sum(e, axis=-1, keepdims=True)           # exact softmax
      o_heads.append(jnp.einsum('bqk,bkd->bqd', attn, vh,
                                preferred_element_type=f32))  # (B, T, dh)
    o_all = jnp.concatenate(o_heads, axis=-1).reshape(rows, inner)
    # single fused output projection + to_out bias + residual
    x = x + jnp.dot(o_all, out_w, preferred_element_type=f32) + out_b

    # Residual(PreNorm(FeedForward)) — exact (erf) GELU, matching torch.nn.GELU
    xn2 = layernorm(x, g2, b2)
    h1 = jnp.dot(xn2, ff_w1, preferred_element_type=f32) + ff_b1
    h1 = 0.5 * h1 * (1.0 + jax.lax.erf(h1 * (1.0 / math.sqrt(2.0))))
    x = x + jnp.dot(h1, ff_w2, preferred_element_type=f32) + ff_b2

  # ---- epilogue: cls tokens -> mlp_head -> sigmoid (fused across batch) ------
  head = head_ref[...]
  hw1 = head[0:dim, :]                            # (dim, mlp_dim)
  hb1 = head[dim:dim + 1, :]                      # (1, mlp_dim)
  hw2_row = head[dim + 1:dim + 2, :]              # (1, mlp_dim) == head_w2^T
  hb2 = head[dim + 2:dim + 3, 0:1]                # (1, 1)
  cls_slab = x.reshape(batch, n_tok_pad, dim)[:, 0, :]        # (B, dim)
  hdn = jnp.dot(cls_slab, hw1, preferred_element_type=f32) + hb1
  hdn = jnp.maximum(hdn, 0.0)
  logit = jnp.sum(hdn * hw2_row, axis=-1, keepdims=True) + hb2  # (B, 1)
  o_ref[...] = (1.0 / (1.0 + jnp.exp(-logit))).astype(o_ref.dtype)


# ----------------------------- parameters ------------------------------------


def init_params(key):
  n_pos = (IMAGE_SIZE // PATCH) ** 2 + 1
  ks = iter(jax.random.split(key, 16 + DEPTH * 8))

  def w(shape, scale=0.02):
    return scale * jax.random.normal(next(ks), shape, dtype=jnp.float32)

  params = {
      "pos_embedding": jax.random.normal(next(ks), (1, n_pos, DIM), jnp.float32),
      "cls_token": jax.random.normal(next(ks), (1, 1, DIM), jnp.float32),
      "patch_w": w((PATCH_DIM, DIM)),
      "patch_b": jnp.zeros((DIM,), jnp.float32),
      "head_w1": w((DIM, MLP_DIM)),
      "head_b1": jnp.zeros((MLP_DIM,), jnp.float32),
      "head_w2": w((MLP_DIM, NUM_CLASSES)),
      "head_b2": jnp.zeros((NUM_CLASSES,), jnp.float32),
      "layers": [],
  }
  for _ in range(DEPTH):
    params["layers"].append({
        "ln1_g": jnp.ones((DIM,), jnp.float32),
        "ln1_b": jnp.zeros((DIM,), jnp.float32),
        "qkv_w": w((DIM, 3 * INNER)),            # to_qkv (bias=False)
        "out_w": w((INNER, DIM)),
        "out_b": jnp.zeros((DIM,), jnp.float32),
        "ln2_g": jnp.ones((DIM,), jnp.float32),
        "ln2_b": jnp.zeros((DIM,), jnp.float32),
        "ff_w1": w((DIM, MLP_DIM)),
        "ff_b1": jnp.zeros((MLP_DIM,), jnp.float32),
        "ff_w2": w((MLP_DIM, DIM)),
        "ff_b2": jnp.zeros((DIM,), jnp.float32),
    })
  return params


# ----------------------------- forward (single grid-less pallas_call) --------


def efficient_vit_forward(params, feats):
  """feats: (B, C, H, W) NCHW — output of efficient_net.extract_features."""
  Bb, Cc, H, W = feats.shape
  p = PATCH
  hh, ww = H // p, W // p
  n_patch = hh * ww
  n_tok = n_patch + 1
  rows = Bb * NT_PAD

  # rearrange 'b c (h p1) (w p2) -> b (h w) (p1 p2 c)'  (layout-only, once)
  y = feats.reshape(Bb, Cc, hh, p, ww, p)
  y = jnp.transpose(y, (0, 2, 4, 3, 5, 1))                    # b h w p1 p2 c
  patches = y.reshape(Bb, n_patch, p * p * Cc)
  # pad each batch to NT_PAD token rows: row 0 = cls slot, tail rows = pad
  patches_pad = jnp.pad(patches, ((0, 0), (1, NT_PAD - n_tok), (0, 0)))
  patches_pad = patches_pad.reshape(rows, p * p * Cc)

  # ---- host-side weight packing into a few lane-dense blobs ----------------
  scale = DIM ** -0.5   # NOTE: source repo uses dim**-0.5 (not dim_head**-0.5)
  pos = params["pos_embedding"][0]                            # (n_pos, DIM)
  cls_row = params["cls_token"].reshape(1, DIM) + pos[0:1]
  prow = params["patch_b"].reshape(1, DIM) + pos[1:n_tok]
  tb_one = jnp.concatenate(
      [cls_row, prow, jnp.zeros((NT_PAD - n_tok, DIM), jnp.float32)], axis=0)
  tok_bias = jnp.tile(tb_one, (Bb, 1))                        # (rows, DIM)
  emb = jnp.concatenate([params["patch_w"], tok_bias], axis=0)

  wA_l, wB_l, vec_l = [], [], []
  for lp in params["layers"]:
    qkv_w = jnp.concatenate(
        [lp["qkv_w"][:, :INNER] * scale, lp["qkv_w"][:, INNER:]], axis=1)
    wa = jnp.concatenate([qkv_w, lp["ff_w1"]], axis=1)        # (DIM, 112)
    wa = jnp.pad(wa, ((0, 0), (0, WA_COLS - wa.shape[1])))    # (DIM, 128)
    wb = jnp.concatenate([lp["out_w"], lp["ff_w2"]], axis=0)  # (80, DIM)

    def pad_d(v):
      return jnp.pad(v, (0, MLP_DIM - v.shape[0]))[None, :]

    vec = jnp.concatenate(
        [pad_d(lp["ln1_g"]), pad_d(lp["ln1_b"]),
         pad_d(lp["ln2_g"]), pad_d(lp["ln2_b"]),
         pad_d(lp["out_b"]), pad_d(lp["ff_b2"]),
         lp["ff_b1"][None, :], jnp.zeros((1, MLP_DIM), jnp.float32)], axis=0)
    wA_l.append(wa)
    wB_l.append(wb)
    vec_l.append(vec)
  wA = jnp.stack(wA_l)                                        # (DEPTH, DIM, 128)
  wB = jnp.stack(wB_l)                                        # (DEPTH, 80, DIM)
  vecs = jnp.stack(vec_l)                                     # (DEPTH, 8, MLP_DIM)

  head = jnp.concatenate(
      [params["head_w1"],
       params["head_b1"][None, :],
       params["head_w2"].reshape(1, MLP_DIM),                 # w2^T as one row
       jnp.pad(params["head_b2"], (0, MLP_DIM - NUM_CLASSES))[None, :]],
      axis=0)
  head = jnp.pad(head, ((0, HEAD_ROWS - head.shape[0]), (0, 0)))

  kern = functools.partial(
      _evit_fused_kernel,
      batch=Bb, n_patch=n_patch, depth=DEPTH, heads=HEADS, dim_head=DIM_HEAD,
      dim=DIM, inner=INNER, mlp_dim=MLP_DIM, n_tok_pad=NT_PAD)

  # Grid-less call: kernel runs exactly once; every operand is a single
  # whole-array VMEM block (6 DMAs total, ~75 KB).  No scratch needed — the
  # (B*8, DIM) activation lives in vregs.
  return pl.pallas_call(
      kern,
      out_shape=jax.ShapeDtypeStruct((Bb, NUM_CLASSES), jnp.float32),
  )(patches_pad, emb, wA, wB, vecs, head)


# ----------------------------- main -------------------------------------------

if __name__ == "__main__":
  key = jax.random.PRNGKey(0)
  pkey, fkey = jax.random.split(key)
  params = init_params(pkey)
  feats = jax.random.normal(fkey, (B, C, FH, FW), dtype=jnp.float32)

  out = jax.jit(lambda f: efficient_vit_forward(params, f))(feats)
  out = jax.block_until_ready(out)

  assert out.shape == (B, NUM_CLASSES), out.shape
  assert bool(jnp.all(jnp.isfinite(out)))
  assert bool(jnp.all((out >= 0.0) & (out <= 1.0)))
  print("KERNEL_OK")
</pallas_src>

<mosaic_0001>
module attributes {stable_mosaic.version = 11 : i64} {
  func.func @_evit_fused_kernel(%arg0: memref<16x32xf32, #tpu.memory_space<vmem>>, %arg1: memref<48x32xf32, #tpu.memory_space<vmem>>, %arg2: memref<2x32x128xf32, #tpu.memory_space<vmem>>, %arg3: memref<2x80x32xf32, #tpu.memory_space<vmem>>, %arg4: memref<2x8x64xf32, #tpu.memory_space<vmem>>, %arg5: memref<40x64xf32, #tpu.memory_space<vmem>>, %arg6: memref<2x1xf32, #tpu.memory_space<vmem>>) attributes {dimension_semantics = [], scalar_prefetch = 0 : i64, scratch_operands = 0 : i64, tpu.core_type = #tpu.core_type<tc>} {
    %c0 = arith.constant 0 : index
    %c0_0 = arith.constant 0 : index
    %0 = vector.load %arg1[%c0, %c0_0] : memref<48x32xf32, #tpu.memory_space<vmem>>, vector<48x32xf32>
    %1 = vector.extract_strided_slice %0 {offsets = [0, 0], sizes = [32, 32], strides = [1, 1]} : vector<48x32xf32> to vector<32x32xf32>
    %2 = vector.extract_strided_slice %0 {offsets = [32, 0], sizes = [16, 32], strides = [1, 1]} : vector<48x32xf32> to vector<16x32xf32>
    %c0_1 = arith.constant 0 : index
    %c0_2 = arith.constant 0 : index
    %3 = vector.load %arg0[%c0_1, %c0_2] : memref<16x32xf32, #tpu.memory_space<vmem>>, vector<16x32xf32>
    %cst = arith.constant dense<0.000000e+00> : vector<16x32xf32>
    %4 = tpu.matmul %3, %1, %cst {dimension_numbers = #tpu.dot_dimension_numbers<[1], [0], [0], [1], [0, 0, 1, 1], [], []>} : vector<16x32xf32>, vector<32x32xf32>, vector<16x32xf32> -> vector<16x32xf32>
    %5 = arith.addf %4, %2 : vector<16x32xf32>
    %6 = tpu.iota {dimensions = array<i32: 1>} : vector<1x8xi32>
    %c5_i32 = arith.constant 5 : i32
    %7 = vector.broadcast %c5_i32 : i32 to vector<1x8xi32>
    %8 = arith.cmpi slt, %6, %7 : vector<1x8xi32>
    %cst_3 = arith.constant 0.000000e+00 : f32
    %cst_4 = arith.constant -1.000000e+30 : f32
    %9 = vector.broadcast %cst_3 : f32 to vector<1x8xf32>
    %10 = vector.broadcast %cst_4 : f32 to vector<1x8xf32>
    %11 = arith.select %8, %9, %10 : vector<1x8xi1>, vector<1x8xf32>
    %c0_5 = arith.constant 0 : index
    %c0_6 = arith.constant 0 : index
    %c0_7 = arith.constant 0 : index
    %12 = vector.load %arg4[%c0_5, %c0_6, %c0_7] : memref<2x8x64xf32, #tpu.memory_space<vmem>>, vector<1x8x64xf32>
    %13 = vector.shape_cast %12 : vector<1x8x64xf32> to vector<8x64xf32>
    %14 = vector.extract_strided_slice %13 {offsets = [0, 0], sizes = [1, 32], strides = [1, 1]} : vector<8x64xf32> to vector<1x32xf32>
    %15 = vector.extract_strided_slice %13 {offsets = [1, 0], sizes = [1, 32], strides = [1, 1]} : vector<8x64xf32> to vector<1x32xf32>
    %16 = vector.extract_strided_slice %13 {offsets = [2, 0], sizes = [1, 32], strides = [1, 1]} : vector<8x64xf32> to vector<1x32xf32>
    %17 = vector.extract_strided_slice %13 {offsets = [3, 0], sizes = [1, 32], strides = [1, 1]} : vector<8x64xf32> to vector<1x32xf32>
    %18 = vector.extract_strided_slice %13 {offsets = [4, 0], sizes = [1, 32], strides = [1, 1]} : vector<8x64xf32> to vector<1x32xf32>
    %19 = vector.extract_strided_slice %13 {offsets = [5, 0], sizes = [1, 32], strides = [1, 1]} : vector<8x64xf32> to vector<1x32xf32>
    %20 = vector.extract_strided_slice %13 {offsets = [6, 0], sizes = [1, 64], strides = [1, 1]} : vector<8x64xf32> to vector<1x64xf32>
    %c0_8 = arith.constant 0 : index
    %c0_9 = arith.constant 0 : index
    %c0_10 = arith.constant 0 : index
    %21 = vector.load %arg2[%c0_8, %c0_9, %c0_10] : memref<2x32x128xf32, #tpu.memory_space<vmem>>, vector<1x32x128xf32>
    %22 = vector.shape_cast %21 : vector<1x32x128xf32> to vector<32x128xf32>
    %23 = vector.extract_strided_slice %22 {offsets = [0, 0], sizes = [32, 48], strides = [1, 1]} : vector<32x128xf32> to vector<32x48xf32>
    %24 = vector.extract_strided_slice %22 {offsets = [0, 48], sizes = [32, 64], strides = [1, 1]} : vector<32x128xf32> to vector<32x64xf32>
    %c0_11 = arith.constant 0 : index
    %c0_12 = arith.constant 0 : index
    %c0_13 = arith.constant 0 : index
    %25 = vector.load %arg3[%c0_11, %c0_12, %c0_13] : memref<2x80x32xf32, #tpu.memory_space<vmem>>, vector<1x80x32xf32>
    %26 = vector.shape_cast %25 : vector<1x80x32xf32> to vector<80x32xf32>
    %27 = vector.extract_strided_slice %26 {offsets = [0, 0], sizes = [16, 32], strides = [1, 1]} : vector<80x32xf32> to vector<16x32xf32>
    %28 = vector.extract_strided_slice %26 {offsets = [16, 0], sizes = [64, 32], strides = [1, 1]} : vector<80x32xf32> to vector<64x32xf32>
    %cst_14 = arith.constant dense<0.000000e+00> : vector<16xf32>
    %29 = vector.multi_reduction <add>, %5, %cst_14 [1] : vector<16x32xf32> to vector<16xf32>
    %30 = vector.shape_cast %29 : vector<16xf32> to vector<16x1xf32>
    %cst_15 = arith.constant 3.200000e+01 : f32
    %31 = vector.broadcast %cst_15 : f32 to vector<16x1xf32>
    %32 = arith.divf %30, %31 : vector<16x1xf32>
    %33 = vector.broadcast %32 : vector<16x1xf32> to vector<16x32xf32>
    %34 = arith.subf %5, %33 : vector<16x32xf32>
    %35 = arith.mulf %34, %34 : vector<16x32xf32>
    %cst_16 = arith.constant dense<0.000000e+00> : vector<16xf32>
    %36 = vector.multi_reduction <add>, %35, %cst_16 [1] : vector<16x32xf32> to vector<16xf32>
    %37 = vector.shape_cast %36 : vector<16xf32> to vector<16x1xf32>
    %cst_17 = arith.constant 3.200000e+01 : f32
    %38 = vector.broadcast %cst_17 : f32 to vector<16x1xf32>
    %39 = arith.divf %37, %38 : vector<16x1xf32>
    %40 = vector.broadcast %32 : vector<16x1xf32> to vector<16x32xf32>
    %41 = arith.subf %5, %40 : vector<16x32xf32>
    %cst_18 = arith.constant 9.99999974E-6 : f32
    %42 = vector.broadcast %cst_18 : f32 to vector<16x1xf32>
    %43 = arith.addf %39, %42 : vector<16x1xf32>
    %44 = math.rsqrt %43 : vector<16x1xf32>
    %45 = vector.broadcast %44 : vector<16x1xf32> to vector<16x32xf32>
    %46 = arith.mulf %41, %45 : vector<16x32xf32>
    %47 = vector.broadcast %14 : vector<1x32xf32> to vector<16x32xf32>
    %48 = arith.mulf %46, %47 : vector<16x32xf32>
    %49 = vector.broadcast %15 : vector<1x32xf32> to vector<16x32xf32>
    %50 = arith.addf %48, %49 : vector<16x32xf32>
    %cst_19 = arith.constant dense<0.000000e+00> : vector<16x48xf32>
    %51 = tpu.matmul %50, %23, %cst_19 {dimension_numbers = #tpu.dot_dimension_numbers<[1], [0], [0], [1], [0, 0, 1, 1], [], []>} : vector<16x32xf32>, vector<32x48xf32>, vector<16x48xf32> -> vector<16x48xf32>
    %52 = vector.shape_cast %51 : vector<16x48xf32> to vector<2x8x48xf32>
    %53 = vector.extract_strided_slice %52 {offsets = [0, 0, 0], sizes = [2, 8, 8], strides = [1, 1, 1]} : vector<2x8x48xf32> to vector<2x8x8xf32>
    %54 = vector.extract_strided_slice %52 {offsets = [0, 0, 16], sizes = [2, 8, 8], strides = [1, 1, 1]} : vector<2x8x48xf32> to vector<2x8x8xf32>
    %55 = vector.extract_strided_slice %52 {offsets = [0, 0, 32], sizes = [2, 8, 8], strides = [1, 1, 1]} : vector<2x8x48xf32> to vector<2x8x8xf32>
    "tpu.trace_start"() <{level = 10 : i32, message = "bqd,bkd->bqk"}> : () -> ()
    %cst_20 = arith.constant dense<0.000000e+00> : vector<2x8x8xf32>
    %56 = tpu.matmul %53, %54, %cst_20 {dimension_numbers = #tpu.dot_dimension_numbers<[2], [2], [1], [1], [0, 0, 0, 1, 1, 1], [0], [0]>} : vector<2x8x8xf32>, vector<2x8x8xf32>, vector<2x8x8xf32> -> vector<2x8x8xf32>
    "tpu.trace_stop"() : () -> ()
    %57 = vector.shape_cast %11 : vector<1x8xf32> to vector<1x1x8xf32>
    %58 = vector.broadcast %57 : vector<1x1x8xf32> to vector<2x8x8xf32>
    %59 = arith.addf %56, %58 : vector<2x8x8xf32>
    %cst_21 = arith.constant dense<0xFF800000> : vector<2x8xf32>
    %60 = vector.multi_reduction <maximumf>, %59, %cst_21 [2] : vector<2x8x8xf32> to vector<2x8xf32>
    %61 = vector.shape_cast %60 : vector<2x8xf32> to vector<2x8x1xf32>
    %62 = vector.broadcast %61 : vector<2x8x1xf32> to vector<2x8x8xf32>
    %63 = arith.subf %59, %62 : vector<2x8x8xf32>
    %64 = math.exp %63 : vector<2x8x8xf32>
    %cst_22 = arith.constant dense<0.000000e+00> : vector<2x8xf32>
    %65 = vector.multi_reduction <add>, %64, %cst_22 [2] : vector<2x8x8xf32> to vector<2x8xf32>
    %66 = vector.shape_cast %65 : vector<2x8xf32> to vector<2x8x1xf32>
    %67 = vector.broadcast %66 : vector<2x8x1xf32> to vector<2x8x8xf32>
    %68 = arith.divf %64, %67 : vector<2x8x8xf32>
    "tpu.trace_start"() <{level = 10 : i32, message = "bqk,bkd->bqd"}> : () -> ()
    %cst_23 = arith.constant dense<0.000000e+00> : vector<2x8x8xf32>
    %69 = tpu.matmul %68, %55, %cst_23 {dimension_numbers = #tpu.dot_dimension_numbers<[2], [1], [1], [2], [0, 0, 0, 1, 1, 2], [0], [0]>} : vector<2x8x8xf32>, vector<2x8x8xf32>, vector<2x8x8xf32> -> vector<2x8x8xf32>
    "tpu.trace_stop"() : () -> ()
    %70 = vector.extract_strided_slice %52 {offsets = [0, 0, 8], sizes = [2, 8, 8], strides = [1, 1, 1]} : vector<2x8x48xf32> to vector<2x8x8xf32>
    %71 = vector.extract_strided_slice %52 {offsets = [0, 0, 24], sizes = [2, 8, 8], strides = [1, 1, 1]} : vector<2x8x48xf32> to vector<2x8x8xf32>
    %72 = vector.extract_strided_slice %52 {offsets = [0, 0, 40], sizes = [2, 8, 8], strides = [1, 1, 1]} : vector<2x8x48xf32> to vector<2x8x8xf32>
    "tpu.trace_start"() <{level = 10 : i32, message = "bqd,bkd->bqk"}> : () -> ()
    %cst_24 = arith.constant dense<0.000000e+00> : vector<2x8x8xf32>
    %73 = tpu.matmul %70, %71, %cst_24 {dimension_numbers = #tpu.dot_dimension_numbers<[2], [2], [1], [1], [0, 0, 0, 1, 1, 1], [0], [0]>} : vector<2x8x8xf32>, vector<2x8x8xf32>, vector<2x8x8xf32> -> vector<2x8x8xf32>
    "tpu.trace_stop"() : () -> ()
    %74 = vector.shape_cast %11 : vector<1x8xf32> to vector<1x1x8xf32>
    %75 = vector.broadcast %74 : vector<1x1x8xf32> to vector<2x8x8xf32>
    %76 = arith.addf %73, %75 : vector<2x8x8xf32>
    %cst_25 = arith.constant dense<0xFF800000> : vector<2x8xf32>
    %77 = vector.multi_reduction <maximumf>, %76, %cst_25 [2] : vector<2x8x8xf32> to vector<2x8xf32>
    %78 = vector.shape_cast %77 : vector<2x8xf32> to vector<2x8x1xf32>
    %79 = vector.broadcast %78 : vector<2x8x1xf32> to vector<2x8x8xf32>
    %80 = arith.subf %76, %79 : vector<2x8x8xf32>
    %81 = math.exp %80 : vector<2x8x8xf32>
    %cst_26 = arith.constant dense<0.000000e+00> : vector<2x8xf32>
    %82 = vector.multi_reduction <add>, %81, %cst_26 [2] : vector<2x8x8xf32> to vector<2x8xf32>
    %83 = vector.shape_cast %82 : vector<2x8xf32> to vector<2x8x1xf32>
    %84 = vector.broadcast %83 : vector<2x8x1xf32> to vector<2x8x8xf32>
    %85 = arith.divf %81, %84 : vector<2x8x8xf32>
    "tpu.trace_start"() <{level = 10 : i32, message = "bqk,bkd->bqd"}> : () -> ()
    %cst_27 = arith.constant dense<0.000000e+00> : vector<2x8x8xf32>
    %86 = tpu.matmul %85, %72, %cst_27 {dimension_numbers = #tpu.dot_dimension_numbers<[2], [1], [1], [2], [0, 0, 0, 1, 1, 2], [0], [0]>} : vector<2x8x8xf32>, vector<2x8x8xf32>, vector<2x8x8xf32> -> vector<2x8x8xf32>
    "tpu.trace_stop"() : () -> ()
    %87 = tpu.concatenate %69, %86 in 2 : vector<2x8x8xf32>, vector<2x8x8xf32> -> vector<2x8x16xf32>
    %88 = vector.shape_cast %87 : vector<2x8x16xf32> to vector<16x16xf32>
    %cst_28 = arith.constant dense<0.000000e+00> : vector<16x32xf32>
    %89 = tpu.matmul %88, %27, %cst_28 {dimension_numbers = #tpu.dot_dimension_numbers<[1], [0], [0], [1], [0, 0, 1, 1], [], []>} : vector<16x16xf32>, vector<16x32xf32>, vector<16x32xf32> -> vector<16x32xf32>
    %90 = arith.addf %5, %89 : vector<16x32xf32>
    %91 = vector.broadcast %18 : vector<1x32xf32> to vector<16x32xf32>
    %92 = arith.addf %90, %91 : vector<16x32xf32>
    %cst_29 = arith.constant dense<0.000000e+00> : vector<16xf32>
    %93 = vector.multi_reduction <add>, %92, %cst_29 [1] : vector<16x32xf32> to vector<16xf32>
    %94 = vector.shape_cast %93 : vector<16xf32> to vector<16x1xf32>
    %cst_30 = arith.constant 3.200000e+01 : f32
    %95 = vector.broadcast %cst_30 : f32 to vector<16x1xf32>
    %96 = arith.divf %94, %95 : vector<16x1xf32>
    %97 = vector.broadcast %96 : vector<16x1xf32> to vector<16x32xf32>
    %98 = arith.subf %92, %97 : vector<16x32xf32>
    %99 = arith.mulf %98, %98 : vector<16x32xf32>
    %cst_31 = arith.constant dense<0.000000e+00> : vector<16xf32>
    %100 = vector.multi_reduction <add>, %99, %cst_31 [1] : vector<16x32xf32> to vector<16xf32>
    %101 = vector.shape_cast %100 : vector<16xf32> to vector<16x1xf32>
    %cst_32 = arith.constant 3.200000e+01 : f32
    %102 = vector.broadcast %cst_32 : f32 to vector<16x1xf32>
    %103 = arith.divf %101, %102 : vector<16x1xf32>
    %104 = vector.broadcast %96 : vector<16x1xf32> to vector<16x32xf32>
    %105 = arith.subf %92, %104 : vector<16x32xf32>
    %cst_33 = arith.constant 9.99999974E-6 : f32
    %106 = vector.broadcast %cst_33 : f32 to vector<16x1xf32>
    %107 = arith.addf %103, %106 : vector<16x1xf32>
    %108 = math.rsqrt %107 : vector<16x1xf32>
    %109 = vector.broadcast %108 : vector<16x1xf32> to vector<16x32xf32>
    %110 = arith.mulf %105, %109 : vector<16x32xf32>
    %111 = vector.broadcast %16 : vector<1x32xf32> to vector<16x32xf32>
    %112 = arith.mulf %110, %111 : vector<16x32xf32>
    %113 = vector.broadcast %17 : vector<1x32xf32> to vector<16x32xf32>
    %114 = arith.addf %112, %113 : vector<16x32xf32>
    %cst_34 = arith.constant dense<0.000000e+00> : vector<16x64xf32>
    %115 = tpu.matmul %114, %24, %cst_34 {dimension_numbers = #tpu.dot_dimension_numbers<[1], [0], [0], [1], [0, 0, 1, 1], [], []>} : vector<16x32xf32>, vector<32x64xf32>, vector<16x64xf32> -> vector<16x64xf32>
    %116 = vector.broadcast %20 : vector<1x64xf32> to vector<16x64xf32>
    %117 = arith.addf %115, %116 : vector<16x64xf32>
    %cst_35 = arith.constant 5.000000e-01 : f32
    %118 = vector.broadcast %cst_35 : f32 to vector<16x64xf32>
    %119 = arith.mulf %118, %117 : vector<16x64xf32>
    %cst_36 = arith.constant 0.707106769 : f32
    %120 = vector.broadcast %cst_36 : f32 to vector<16x64xf32>
    %121 = arith.mulf %117, %120 : vector<16x64xf32>
    %122 = math.erf %121 : vector<16x64xf32>
    %cst_37 = arith.constant 1.000000e+00 : f32
    %123 = vector.broadcast %cst_37 : f32 to vector<16x64xf32>
    %124 = arith.addf %123, %122 : vector<16x64xf32>
    %125 = arith.mulf %119, %124 : vector<16x64xf32>
    %cst_38 = arith.constant dense<0.000000e+00> : vector<16x32xf32>
    %126 = tpu.matmul %125, %28, %cst_38 {dimension_numbers = #tpu.dot_dimension_numbers<[1], [0], [0], [1], [0, 0, 1, 1], [], []>} : vector<16x64xf32>, vector<64x32xf32>, vector<16x32xf32> -> vector<16x32xf32>
    %127 = arith.addf %92, %126 : vector<16x32xf32>
    %128 = vector.broadcast %19 : vector<1x32xf32> to vector<16x32xf32>
    %129 = arith.addf %127, %128 : vector<16x32xf32>
    %c1 = arith.constant 1 : index
    %c0_39 = arith.constant 0 : index
    %c0_40 = arith.constant 0 : index
    %130 = vector.load %arg4[%c1, %c0_39, %c0_40] : memref<2x8x64xf32, #tpu.memory_space<vmem>>, vector<1x8x64xf32>
    %131 = vector.shape_cast %130 : vector<1x8x64xf32> to vector<8x64xf32>
    %132 = vector.extract_strided_slice %131 {offsets = [0, 0], sizes = [1, 32], strides = [1, 1]} : vector<8x64xf32> to vector<1x32xf32>
    %133 = vector.extract_strided_slice %131 {offsets = [1, 0], sizes = [1, 32], strides = [1, 1]} : vector<8x64xf32> to vector<1x32xf32>
    %134 = vector.extract_strided_slice %131 {offsets = [2, 0], sizes = [1, 32], strides = [1, 1]} : vector<8x64xf32> to vector<1x32xf32>
    %135 = vector.extract_strided_slice %131 {offsets = [3, 0], sizes = [1, 32], strides = [1, 1]} : vector<8x64xf32> to vector<1x32xf32>
    %136 = vector.extract_strided_slice %131 {offsets = [4, 0], sizes = [1, 32], strides = [1, 1]} : vector<8x64xf32> to vector<1x32xf32>
    %137 = vector.extract_strided_slice %131 {offsets = [5, 0], sizes = [1, 32], strides = [1, 1]} : vector<8x64xf32> to vector<1x32xf32>
    %138 = vector.extract_strided_slice %131 {offsets = [6, 0], sizes = [1, 64], strides = [1, 1]} : vector<8x64xf32> to vector<1x64xf32>
    %c1_41 = arith.constant 1 : index
    %c0_42 = arith.constant 0 : index
    %c0_43 = arith.constant 0 : index
    %139 = vector.load %arg2[%c1_41, %c0_42, %c0_43] : memref<2x32x128xf32, #tpu.memory_space<vmem>>, vector<1x32x128xf32>
    %140 = vector.shape_cast %139 : vector<1x32x128xf32> to vector<32x128xf32>
    %141 = vector.extract_strided_slice %140 {offsets = [0, 0], sizes = [32, 48], strides = [1, 1]} : vector<32x128xf32> to vector<32x48xf32>
    %142 = vector.extract_strided_slice %140 {offsets = [0, 48], sizes = [32, 64], strides = [1, 1]} : vector<32x128xf32> to vector<32x64xf32>
    %c1_44 = arith.constant 1 : index
    %c0_45 = arith.constant 0 : index
    %c0_46 = arith.constant 0 : index
    %143 = vector.load %arg3[%c1_44, %c0_45, %c0_46] : memref<2x80x32xf32, #tpu.memory_space<vmem>>, vector<1x80x32xf32>
    %144 = vector.shape_cast %143 : vector<1x80x32xf32> to vector<80x32xf32>
    %145 = vector.extract_strided_slice %144 {offsets = [0, 0], sizes = [16, 32], strides = [1, 1]} : vector<80x32xf32> to vector<16x32xf32>
    %146 = vector.extract_strided_slice %144 {offsets = [16, 0], sizes = [64, 32], strides = [1, 1]} : vector<80x32xf32> to vector<64x32xf32>
    %cst_47 = arith.constant dense<0.000000e+00> : vector<16xf32>
    %147 = vector.multi_reduction <add>, %129, %cst_47 [1] : vector<16x32xf32> to vector<16xf32>
    %148 = vector.shape_cast %147 : vector<16xf32> to vector<16x1xf32>
    %cst_48 = arith.constant 3.200000e+01 : f32
    %149 = vector.broadcast %cst_48 : f32 to vector<16x1xf32>
    %150 = arith.divf %148, %149 : vector<16x1xf32>
    %151 = vector.broadcast %150 : vector<16x1xf32> to vector<16x32xf32>
    %152 = arith.subf %129, %151 : vector<16x32xf32>
    %153 = arith.mulf %152, %152 : vector<16x32xf32>
    %cst_49 = arith.constant dense<0.000000e+00> : vector<16xf32>
    %154 = vector.multi_reduction <add>, %153, %cst_49 [1] : vector<16x32xf32> to vector<16xf32>
    %155 = vector.shape_cast %154 : vector<16xf32> to vector<16x1xf32>
    %cst_50 = arith.constant 3.200000e+01 : f32
    %156 = vector.broadcast %cst_50 : f32 to vector<16x1xf32>
    %157 = arith.divf %155, %156 : vector<16x1xf32>
    %158 = vector.broadcast %150 : vector<16x1xf32> to vector<16x32xf32>
    %159 = arith.subf %129, %158 : vector<16x32xf32>
    %cst_51 = arith.constant 9.99999974E-6 : f32
    %160 = vector.broadcast %cst_51 : f32 to vector<16x1xf32>
    %161 = arith.addf %157, %160 : vector<16x1xf32>
    %162 = math.rsqrt %161 : vector<16x1xf32>
    %163 = vector.broadcast %162 : vector<16x1xf32> to vector<16x32xf32>
    %164 = arith.mulf %159, %163 : vector<16x32xf32>
    %165 = vector.broadcast %132 : vector<1x32xf32> to vector<16x32xf32>
    %166 = arith.mulf %164, %165 : vector<16x32xf32>
    %167 = vector.broadcast %133 : vector<1x32xf32> to vector<16x32xf32>
    %168 = arith.addf %166, %167 : vector<16x32xf32>
    %cst_52 = arith.constant dense<0.000000e+00> : vector<16x48xf32>
    %169 = tpu.matmul %168, %141, %cst_52 {dimension_numbers = #tpu.dot_dimension_numbers<[1], [0], [0], [1], [0, 0, 1, 1], [], []>} : vector<16x32xf32>, vector<32x48xf32>, vector<16x48xf32> -> vector<16x48xf32>
    %170 = vector.shape_cast %169 : vector<16x48xf32> to vector<2x8x48xf32>
    %171 = vector.extract_strided_slice %170 {offsets = [0, 0, 0], sizes = [2, 8, 8], strides = [1, 1, 1]} : vector<2x8x48xf32> to vector<2x8x8xf32>
    %172 = vector.extract_strided_slice %170 {offsets = [0, 0, 16], sizes = [2, 8, 8], strides = [1, 1, 1]} : vector<2x8x48xf32> to vector<2x8x8xf32>
    %173 = vector.extract_strided_slice %170 {offsets = [0, 0, 32], sizes = [2, 8, 8], strides = [1, 1, 1]} : vector<2x8x48xf32> to vector<2x8x8xf32>
    "tpu.trace_start"() <{level = 10 : i32, message = "bqd,bkd->bqk"}> : () -> ()
    %cst_53 = arith.constant dense<0.000000e+00> : vector<2x8x8xf32>
    %174 = tpu.matmul %171, %172, %cst_53 {dimension_numbers = #tpu.dot_dimension_numbers<[2], [2], [1], [1], [0, 0, 0, 1, 1, 1], [0], [0]>} : vector<2x8x8xf32>, vector<2x8x8xf32>, vector<2x8x8xf32> -> vector<2x8x8xf32>
    "tpu.trace_stop"() : () -> ()
    %175 = vector.shape_cast %11 : vector<1x8xf32> to vector<1x1x8xf32>
    %176 = vector.broadcast %175 : vector<1x1x8xf32> to vector<2x8x8xf32>
    %177 = arith.addf %174, %176 : vector<2x8x8xf32>
    %cst_54 = arith.constant dense<0xFF800000> : vector<2x8xf32>
    %178 = vector.multi_reduction <maximumf>, %177, %cst_54 [2] : vector<2x8x8xf32> to vector<2x8xf32>
    %179 = vector.shape_cast %178 : vector<2x8xf32> to vector<2x8x1xf32>
    %180 = vector.broadcast %179 : vector<2x8x1xf32> to vector<2x8x8xf32>
    %181 = arith.subf %177, %180 : vector<2x8x8xf32>
    %182 = math.exp %181 : vector<2x8x8xf32>
    %cst_55 = arith.constant dense<0.000000e+00> : vector<2x8xf32>
    %183 = vector.multi_reduction <add>, %182, %cst_55 [2] : vector<2x8x8xf32> to vector<2x8xf32>
    %184 = vector.shape_cast %183 : vector<2x8xf32> to vector<2x8x1xf32>
    %185 = vector.broadcast %184 : vector<2x8x1xf32> to vector<2x8x8xf32>
    %186 = arith.divf %182, %185 : vector<2x8x8xf32>
    "tpu.trace_start"() <{level = 10 : i32, message = "bqk,bkd->bqd"}> : () -> ()
    %cst_56 = arith.constant dense<0.000000e+00> : vector<2x8x8xf32>
    %187 = tpu.matmul %186, %173, %cst_56 {dimension_numbers = #tpu.dot_dimension_numbers<[2], [1], [1], [2], [0, 0, 0, 1, 1, 2], [0], [0]>} : vector<2x8x8xf32>, vector<2x8x8xf32>, vector<2x8x8xf32> -> vector<2x8x8xf32>
    "tpu.trace_stop"() : () -> ()
    %188 = vector.extract_strided_slice %170 {offsets = [0, 0, 8], sizes = [2, 8, 8], strides = [1, 1, 1]} : vector<2x8x48xf32> to vector<2x8x8xf32>
    %189 = vector.extract_strided_slice %170 {offsets = [0, 0, 24], sizes = [2, 8, 8], strides = [1, 1, 1]} : vector<2x8x48xf32> to vector<2x8x8xf32>
    %190 = vector.extract_strided_slice %170 {offsets = [0, 0, 40], sizes = [2, 8, 8], strides = [1, 1, 1]} : vector<2x8x48xf32> to vector<2x8x8xf32>
    "tpu.trace_start"() <{level = 10 : i32, message = "bqd,bkd->bqk"}> : () -> ()
    %cst_57 = arith.constant dense<0.000000e+00> : vector<2x8x8xf32>
    %191 = tpu.matmul %188, %189, %cst_57 {dimension_numbers = #tpu.dot_dimension_numbers<[2], [2], [1], [1], [0, 0, 0, 1, 1, 1], [0], [0]>} : vector<2x8x8xf32>, vector<2x8x8xf32>, vector<2x8x8xf32> -> vector<2x8x8xf32>
    "tpu.trace_stop"() : () -> ()
    %192 = vector.shape_cast %11 : vector<1x8xf32> to vector<1x1x8xf32>
    %193 = vector.broadcast %192 : vector<1x1x8xf32> to vector<2x8x8xf32>
    %194 = arith.addf %191, %193 : vector<2x8x8xf32>
    %cst_58 = arith.constant dense<0xFF800000> : vector<2x8xf32>
    %195 = vector.multi_reduction <maximumf>, %194, %cst_58 [2] : vector<2x8x8xf32> to vector<2x8xf32>
    %196 = vector.shape_cast %195 : vector<2x8xf32> to vector<2x8x1xf32>
    %197 = vector.broadcast %196 : vector<2x8x1xf32> to vector<2x8x8xf32>
    %198 = arith.subf %194, %197 : vector<2x8x8xf32>
    %199 = math.exp %198 : vector<2x8x8xf32>
    %cst_59 = arith.constant dense<0.000000e+00> : vector<2x8xf32>
    %200 = vector.multi_reduction <add>, %199, %cst_59 [2] : vector<2x8x8xf32> to vector<2x8xf32>
    %201 = vector.shape_cast %200 : vector<2x8xf32> to vector<2x8x1xf32>
    %202 = vector.broadcast %201 : vector<2x8x1xf32> to vector<2x8x8xf32>
    %203 = arith.divf %199, %202 : vector<2x8x8xf32>
    "tpu.trace_start"() <{level = 10 : i32, message = "bqk,bkd->bqd"}> : () -> ()
    %cst_60 = arith.constant dense<0.000000e+00> : vector<2x8x8xf32>
    %204 = tpu.matmul %203, %190, %cst_60 {dimension_numbers = #tpu.dot_dimension_numbers<[2], [1], [1], [2], [0, 0, 0, 1, 1, 2], [0], [0]>} : vector<2x8x8xf32>, vector<2x8x8xf32>, vector<2x8x8xf32> -> vector<2x8x8xf32>
    "tpu.trace_stop"() : () -> ()
    %205 = tpu.concatenate %187, %204 in 2 : vector<2x8x8xf32>, vector<2x8x8xf32> -> vector<2x8x16xf32>
    %206 = vector.shape_cast %205 : vector<2x8x16xf32> to vector<16x16xf32>
    %cst_61 = arith.constant dense<0.000000e+00> : vector<16x32xf32>
    %207 = tpu.matmul %206, %145, %cst_61 {dimension_numbers = #tpu.dot_dimension_numbers<[1], [0], [0], [1], [0, 0, 1, 1], [], []>} : vector<16x16xf32>, vector<16x32xf32>, vector<16x32xf32> -> vector<16x32xf32>
    %208 = arith.addf %129, %207 : vector<16x32xf32>
    %209 = vector.broadcast %136 : vector<1x32xf32> to vector<16x32xf32>
    %210 = arith.addf %208, %209 : vector<16x32xf32>
    %cst_62 = arith.constant dense<0.000000e+00> : vector<16xf32>
    %211 = vector.multi_reduction <add>, %210, %cst_62 [1] : vector<16x32xf32> to vector<16xf32>
    %212 = vector.shape_cast %211 : vector<16xf32> to vector<16x1xf32>
    %cst_63 = arith.constant 3.200000e+01 : f32
    %213 = vector.broadcast %cst_63 : f32 to vector<16x1xf32>
    %214 = arith.divf %212, %213 : vector<16x1xf32>
    %215 = vector.broadcast %214 : vector<16x1xf32> to vector<16x32xf32>
    %216 = arith.subf %210, %215 : vector<16x32xf32>
    %217 = arith.mulf %216, %216 : vector<16x32xf32>
    %cst_64 = arith.constant dense<0.000000e+00> : vector<16xf32>
    %218 = vector.multi_reduction <add>, %217, %cst_64 [1] : vector<16x32xf32> to vector<16xf32>
    %219 = vector.shape_cast %218 : vector<16xf32> to vector<16x1xf32>
    %cst_65 = arith.constant 3.200000e+01 : f32
    %220 = vector.broadcast %cst_65 : f32 to vector<16x1xf32>
    %221 = arith.divf %219, %220 : vector<16x1xf32>
    %222 = vector.broadcast %214 : vector<16x1xf32> to vector<16x32xf32>
    %223 = arith.subf %210, %222 : vector<16x32xf32>
    %cst_66 = arith.constant 9.99999974E-6 : f32
    %224 = vector.broadcast %cst_66 : f32 to vector<16x1xf32>
    %225 = arith.addf %221, %224 : vector<16x1xf32>
    %226 = math.rsqrt %225 : vector<16x1xf32>
    %227 = vector.broadcast %226 : vector<16x1xf32> to vector<16x32xf32>
    %228 = arith.mulf %223, %227 : vector<16x32xf32>
    %229 = vector.broadcast %134 : vector<1x32xf32> to vector<16x32xf32>
    %230 = arith.mulf %228, %229 : vector<16x32xf32>
    %231 = vector.broadcast %135 : vector<1x32xf32> to vector<16x32xf32>
    %232 = arith.addf %230, %231 : vector<16x32xf32>
    %cst_67 = arith.constant dense<0.000000e+00> : vector<16x64xf32>
    %233 = tpu.matmul %232, %142, %cst_67 {dimension_numbers = #tpu.dot_dimension_numbers<[1], [0], [0], [1], [0, 0, 1, 1], [], []>} : vector<16x32xf32>, vector<32x64xf32>, vector<16x64xf32> -> vector<16x64xf32>
    %234 = vector.broadcast %138 : vector<1x64xf32> to vector<16x64xf32>
    %235 = arith.addf %233, %234 : vector<16x64xf32>
    %cst_68 = arith.constant 5.000000e-01 : f32
    %236 = vector.broadcast %cst_68 : f32 to vector<16x64xf32>
    %237 = arith.mulf %236, %235 : vector<16x64xf32>
    %cst_69 = arith.constant 0.707106769 : f32
    %238 = vector.broadcast %cst_69 : f32 to vector<16x64xf32>
    %239 = arith.mulf %235, %238 : vector<16x64xf32>
    %240 = math.erf %239 : vector<16x64xf32>
    %cst_70 = arith.constant 1.000000e+00 : f32
    %241 = vector.broadcast %cst_70 : f32 to vector<16x64xf32>
    %242 = arith.addf %241, %240 : vector<16x64xf32>
    %243 = arith.mulf %237, %242 : vector<16x64xf32>
    %cst_71 = arith.constant dense<0.000000e+00> : vector<16x32xf32>
    %244 = tpu.matmul %243, %146, %cst_71 {dimension_numbers = #tpu.dot_dimension_numbers<[1], [0], [0], [1], [0, 0, 1, 1], [], []>} : vector<16x64xf32>, vector<64x32xf32>, vector<16x32xf32> -> vector<16x32xf32>
    %245 = arith.addf %210, %244 : vector<16x32xf32>
    %246 = vector.broadcast %137 : vector<1x32xf32> to vector<16x32xf32>
    %247 = arith.addf %245, %246 : vector<16x32xf32>
    %c0_72 = arith.constant 0 : index
    %c0_73 = arith.constant 0 : index
    %248 = vector.load %arg5[%c0_72, %c0_73] : memref<40x64xf32, #tpu.memory_space<vmem>>, vector<40x64xf32>
    %249 = vector.extract_strided_slice %248 {offsets = [0, 0], sizes = [32, 64], strides = [1, 1]} : vector<40x64xf32> to vector<32x64xf32>
    %250 = vector.extract_strided_slice %248 {offsets = [32, 0], sizes = [1, 64], strides = [1, 1]} : vector<40x64xf32> to vector<1x64xf32>
    %251 = vector.extract_strided_slice %248 {offsets = [33, 0], sizes = [1, 64], strides = [1, 1]} : vector<40x64xf32> to vector<1x64xf32>
    %252 = vector.extract_strided_slice %248 {offsets = [34, 0], sizes = [1, 1], strides = [1, 1]} : vector<40x64xf32> to vector<1x1xf32>
    %253 = vector.shape_cast %247 : vector<16x32xf32> to vector<2x8x32xf32>
    %254 = vector.extract_strided_slice %253 {offsets = [0, 0, 0], sizes = [2, 1, 32], strides = [1, 1, 1]} : vector<2x8x32xf32> to vector<2x1x32xf32>
    %255 = vector.shape_cast %254 : vector<2x1x32xf32> to vector<2x32xf32>
    %cst_74 = arith.constant dense<0.000000e+00> : vector<2x64xf32>
    %256 = tpu.matmul %255, %249, %cst_74 {dimension_numbers = #tpu.dot_dimension_numbers<[1], [0], [0], [1], [0, 0, 1, 1], [], []>} : vector<2x32xf32>, vector<32x64xf32>, vector<2x64xf32> -> vector<2x64xf32>
    %257 = vector.broadcast %250 : vector<1x64xf32> to vector<2x64xf32>
    %258 = arith.addf %256, %257 : vector<2x64xf32>
    %cst_75 = arith.constant 0.000000e+00 : f32
    %259 = vector.broadcast %cst_75 : f32 to vector<2x64xf32>
    %260 = arith.maximumf %258, %259 : vector<2x64xf32>
    %261 = vector.broadcast %251 : vector<1x64xf32> to vector<2x64xf32>
    %262 = arith.mulf %260, %261 : vector<2x64xf32>
    %cst_76 = arith.constant dense<0.000000e+00> : vector<2xf32>
    %263 = vector.multi_reduction <add>, %262, %cst_76 [1] : vector<2x64xf32> to vector<2xf32>
    %264 = vector.shape_cast %263 : vector<2xf32> to vector<2x1xf32>
    %265 = vector.broadcast %252 : vector<1x1xf32> to vector<2x1xf32>
    %266 = arith.addf %264, %265 : vector<2x1xf32>
    %cst_77 = arith.constant 0.000000e+00 : f32
    %267 = vector.broadcast %cst_77 : f32 to vector<2x1xf32>
    %268 = arith.subf %267, %266 : vector<2x1xf32>
    %269 = math.exp %268 : vector<2x1xf32>
    %cst_78 = arith.constant 1.000000e+00 : f32
    %270 = vector.broadcast %cst_78 : f32 to vector<2x1xf32>
    %271 = arith.addf %270, %269 : vector<2x1xf32>
    %cst_79 = arith.constant 1.000000e+00 : f32
    %272 = vector.broadcast %cst_79 : f32 to vector<2x1xf32>
    %273 = arith.divf %272, %271 : vector<2x1xf32>
    %c0_80 = arith.constant 0 : index
    %c0_81 = arith.constant 0 : index
    %274 = vector.load %arg6[%c0_80, %c0_81] : memref<2x1xf32, #tpu.memory_space<vmem>>, vector<2x1xf32>
    tpu.vector_store %arg6[%c0_80, %c0_81], %273 {strides = array<i32>} : memref<2x1xf32, #tpu.memory_space<vmem>>, vector<2x1xf32>,
    return
  }
}

</mosaic_0001>

<bundles_post_ra>
// kernel: _lambda_.1
= control target key start
LH: loop header
LB: loop body
LE: loop exit
PB: predicated region body
PF: predicated region fallthrough
CT: control target
= control target key end

     0   :  { %vm31_vm0 = vcmask 261120   ;;  %v113_v35 = vlaneseq  ;;  %v3023_v54 = vmov 0.0   ;;  %vm3024_vm1 = vmmov 0   ;;  %s3025_s21 = smov 112   ;;  %s3027_s22 = smov 96   ;;  %s3536_s1 = inlined_call_operand.vmem [shape: f32[48,32], index: 1, kind: input, shape index: {}]   ;;  %s3537_s0 = inlined_call_operand.vmem [shape: f32[16,32], index: 0, kind: input, shape index: {}]   ;;  %s3538_s2 = inlined_call_operand.vmem [shape: f32[2,32,128], index: 2, kind: input, shape index: {}]   ;;  %s3539_s4 = inlined_call_operand.vmem [shape: f32[2,8,64], index: 4, kind: input, shape index: {}]   ;;  %s3540_s3 = inlined_call_operand.vmem [shape: f32[2,80,32], index: 3, kind: input, shape index: {}]   ;;  %s3541_s5 = inlined_call_operand.vmem [shape: f32[40,64], index: 5, kind: input, shape index: {}]   ;;  %s3542_s6 = inlined_call_operand.vmem [shape: f32[2,1], index: 6, kind: output, shape index: {}]  }
   0x1   :  { %v23_v0 = vld [vmem:[%s3536_s1] sm:$0xff]  ;;  %v24_v1 = vld [vmem:[%s3536_s1 + $0x8] sm:$0xff]  ;;  %v25_v2 = vld [vmem:[%s3536_s1 + $0x10] sm:$0xff]  ;;  %vm255_vm2 = vcmask 64512   ;;  %v3026_v60 = vmov -1e+30  }
   0x2   :  { %v2846_v3 = vpack.c.bf16 %v24_v1, %v23_v0  ;;  %v26_v4 = vld [vmem:[%s3536_s1 + $0x18] sm:$0xff]  ;;  %v29_v5 = vld [vmem:[%s3537_s0] sm:$0xff]  ;;  %v30_v7 = vld [vmem:[%s3537_s0 + $0x8] sm:$0xff]  ;;  %v3133_v39 = vshrl.u32 %v113_v35, 7  ;;  %v114_v59 = vand.u32 127, %v113_v35  ;;  %s3028_s23 = smov 104  }
   0x3   :  { %v2850_v6 = vpack.c.bf16 %v26_v4, %v25_v2  ;;  %2656 = vmatprep.mubr.msk.f32.mxu0 %vm31_vm0, %v29_v5  ;;  %v27_v8 = vld [vmem:[%s3536_s1 + $0x20] sm:$0xff]  ;;  %v28_v10 = vld [vmem:[%s3536_s1 + $0x28] sm:$0xff]  ;;  %v3120_v28 = vld [vmem:[%s3538_s2 + $0x10] sm:$0xff]  ;;  %s3029_s24 = smov 120   ;;  %s3030_s25 = smov 88   ;;  %vm921_vm4 = vcmask 130048  }
   0x4   :  { %2847 = vmatprep.subr.bf16.mxu0 %v2846_v3  ;;  %v3110_v26 = vld [vmem:[%s3538_s2] sm:$0xff]  ;;  %v3115_v27 = vld [vmem:[%s3538_s2 + $0x8] sm:$0xff]  ;;  %v3129_v31 = vld [vmem:[%s3538_s2 + $0x18] sm:$0xff]  ;;  %v3136_v41 = vsub.s32 0, %v3133_v39  ;;  %v3144_v43 = vsub.s32 1, %v3133_v39  ;;  %vm115_vm3 = vcmp.lt.s32.totalorder %v114_v59, 5 }
   0x5   :  { %2849 = vmatpush3.bf16.msra.mxu0 %v2846_v3  ;;  %v2943_v29 = vpack.i.bf16 %v3115_v27, %v3110_v26  ;;  %v2854_v30 = vpack.c.bf16 %v3115_v27, %v3110_v26  ;;  %v2858_v32 = vpack.c.bf16 %v3129_v31, %v3120_v28  ;;  %v3141_v42 = vld [vmem:[%s3539_s4] sm:$0xff]  ;;  %v3178_v61 = vsel %vm115_vm3, 0.0, %v3026_v60  ;;  %s3031_s30 = smov 8   ;;  %s3032_s7 = smov 80  }
   0x6   :  { %2851 = vmatprep.subr.bf16.mxu0 %v2850_v6  ;;  %v162_v44 = vrot.slane %v3141_v42, %v3136_v41  ;;  %v168_v47 = vrot.slane %v3141_v42, %v3144_v43  ;;  %v3269_v26 = vsub.s32 2, %v3133_v39  ;;  %vm1160_vm5 = vcmask 523264  }
   0x7   :  { %2855 = vmatprep.subr.bf16.mxu1 %v2854_v30  ;;  %vm2394_vm6 = vcmask 1041409   ;;  %vm2474_vm7 = vcmask 517120   ;;  %vm2489_vm8 = vcmask 1024  }
   0x8   :  { %2857 = vmatpush3.bf16.msra.mxu1 %v2854_v30 }
   0x9   :  { %2853 = vmatpush3.bf16.msra.mxu0 %v2850_v6  ;;  %2859 = vmatprep.subr.bf16.mxu1 %v2858_v32 }
   0xa   :  { %2670 = vmatprep.subr.mxu0 %v3023_v54 }
   0xc   :  { %2657 = vmatmul.mubr.msk.f32.vlgmr.msra.gmra.mrb[0].mxu0 %vm31_vm0, %v30_v7  ;;  %2861 = vmatpush3.bf16.msra.mxu1 %v2858_v32 }
   0xd   :  { %2675 = vmatprep.subr.mxu1 %v3023_v54  ;;  %2672 = vmatprep.mubr.msk.f32.mxu0 %vm3024_vm1, %v3023_v54 }
  0xdf   :  { %v2658_v9 = vpop.f32.mrb[0].mxu0 }
  0xe0   :  { %v104_v11 = vpop.f32.mrb[1].mxu0  ;;  %v3097_v13 = vadd.f32 %v2658_v9, %v28_v10 }
  0xe1   :  { %v3095_v12 = vadd.f32 %v104_v11, %v27_v8 }
  0xe2   :  { %v135_v15 = vsel %vm31_vm0, %v3097_v13, 0.0 }
  0xe3   :  { %v132_v14 = vsel %vm31_vm0, %v3095_v12, 0.0 }
  0xe4   :  { %133 = vadd.xlane.f32.xlu0 %v132_v14 }
  0xe8   :  { %136 = vadd.xlane.f32.xlu0 %v135_v15 }
 0x171   :  { %v134_v16 = vpop.xlane.xlu0 %133 }
 0x172   :  { %v139_v17 = vmul.f32 0.03125, %v134_v16 }
 0x174   :  { %v141_v18 = vsub.f32 %v3095_v12, %v139_v17 }
 0x175   :  { %v137_v19 = vpop.xlane.xlu0 %136 }
 0x176   :  { %v140_v20 = vmul.f32 0.03125, %v137_v19  ;;  %v143_v21 = vmul.f32 %v141_v18, %v141_v18 }
 0x178   :  { %v142_v22 = vsub.f32 %v3097_v13, %v140_v20  ;;  %v145_v23 = vsel %vm31_vm0, %v143_v21, 0.0 }
 0x179   :  { %146 = vadd.xlane.f32.xlu1 %v145_v23 }
 0x17a   :  { %v144_v24 = vmul.f32 %v142_v22, %v142_v22 }
 0x17c   :  { %v148_v25 = vsel %vm31_vm0, %v144_v24, 0.0 }
 0x17d   :  { %149 = vadd.xlane.f32.xlu1 %v148_v25 }
 0x206   :  { %v147_v33 = vpop.xlane.xlu1 %146 }
 0x207   :  { %v151_v34 = vmul.f32 0.03125, %v147_v33 }
 0x209   :  { %v153_v36 = vadd.f32 1e-05, %v151_v34 }
 0x20a   :  { %v150_v37 = vpop.xlane.xlu1 %149 }
 0x20b   :  { %2963 = vrsqrt.f32 %v153_v36  ;;  %v152_v38 = vmul.f32 0.03125, %v150_v37 }
 0x20d   :  { %v154_v40 = vadd.f32 1e-05, %v152_v38 }
 0x20f   :  { %2965 = vrsqrt.f32 %v154_v40 }
 0x215   :  { %v2964_v45 = vpop.eup %2963 }
 0x216   :  { %v157_v46 = vmul.f32 %v2964_v45, %v141_v18 }
 0x218   :  { %v163_v48 = vmul.f32 %v162_v44, %v157_v46 }
 0x219   :  { %v2966_v49 = vpop.eup %2965 }
 0x21a   :  { %v158_v50 = vmul.f32 %v2966_v49, %v142_v22  ;;  %v169_v51 = vadd.f32 %v168_v47, %v163_v48 }
 0x21c   :  { %v164_v52 = vmul.f32 %v162_v44, %v158_v50  ;;  %2667 = vmatprep.mubr.msk.f32.mxu1 %vm31_vm0, %v169_v51 }
 0x21e   :  { %v170_v53 = vadd.f32 %v168_v47, %v164_v52 }
 0x220   :  { %2668 = vmatmul.mubr.msk.f32.vlgmr.msra.gmra.mrb[0].mxu1 %vm31_vm0, %v170_v53 }
 0x221   :  { %2677 = vmatprep.mubr.msk.f32.mxu1 %vm3024_vm1, %v3023_v54 }
 0x2f3   :  { %v3158_v55 = vpop.f32.mrb[0].mxu1 }
 0x2f4   :  { %331 = vrot.lane.b32.xlu1 %v3158_v55, %s3025_s21  ;;  %v3162_v56 = vpop.f32.mrb[1].mxu1 }
 0x2f5   :  { %253 = vrot.lane.b32.xlu0 %v3162_v56, %s3025_s21 }
 0x366   :  { %v332_v57 = vpop.permute.xlu1 %331 }
 0x367   :  { %2676 = vmatpush3.xpose.msk.msra.mxu1 %vm255_vm2, %v332_v57  ;;  %v254_v58 = vpop.permute.xlu0 %253 }
 0x368   :  { %2671 = vmatpush3.xpose.msk.msra.mxu0 %vm255_vm2, %v254_v58  ;;  %2685 = vmatprep.subr.mxu1 %v3023_v54 }
 0x369   :  { %2680 = vmatprep.subr.mxu0 %v3023_v54 }
 0x36a   :  { %2678 = vmatmul.mubr.msk.f32.vlgmr.msra.gmra.mrb[2].mxu1 %vm255_vm2, %v3158_v55 }
 0x36b   :  { %2673 = vmatmul.mubr.msk.f32.vlgmr.msra.gmra.mrb[2].mxu0 %vm255_vm2, %v3162_v56  ;;  %2687 = vmatprep.mubr.msk.f32.mxu1 %vm3024_vm1, %v3023_v54 }
 0x36c   :  { %2682 = vmatprep.mubr.msk.f32.mxu0 %vm3024_vm1, %v3023_v54 }
 0x43d   :  { %v403_v62 = vpop.f32.mrb[2].mxu1 }
 0x43e   :  { %v404_v63 = vadd.f32 %v403_v62, %v3178_v61  ;;  %v326_v0 = vpop.f32.mrb[2].mxu0  ;;  %v2679_v1 = vpop.f32.mrb[3].mxu1 }
 0x43f   :  { %v327_v2 = vadd.f32 %v326_v0, %v3178_v61  ;;  %v2674_v3 = vpop.f32.mrb[3].mxu0 }
 0x440   :  { %v410_v4 = vsel %vm255_vm2, %v404_v63, -inf }
 0x441   :  { %411 = vmax.xlane.f32.xlu0 %v410_v4  ;;  %v407_v5 = vsel %vm255_vm2, %v327_v2, -inf }
 0x442   :  { %408 = vmax.xlane.f32.xlu1 %v407_v5 }
 0x453   :  { %505 = vrot.lane.b32.xlu1 %v3158_v55, %s3027_s22 }
 0x457   :  { %583 = vrot.lane.b32.xlu1 %v3162_v56, %s3028_s23  ;;  %429 = vrot.lane.b32.xlu0 %v3162_v56, %s3027_s22 }
 0x45b   :  { %661 = vrot.lane.b32.xlu1 %v3158_v55, %s3028_s23 }
 0x4ce   :  { %v412_v6 = vpop.xlane.xlu0 %411 }
 0x4cf   :  { %v414_v7 = vsub.f32 %v404_v63, %v412_v6  ;;  %v409_v8 = vpop.xlane.xlu1 %408 }
 0x4d0   :  { %v413_v9 = vsub.f32 %v327_v2, %v409_v8  ;;  %v122_v8 = vld [vmem:[%s3540_s3] sm:$0xff] }
 0x4d1   :  { %v417_v10 = vmul.f32 1.442695, %v414_v7 }
 0x4d2   :  { %v415_v11 = vmul.f32 1.442695, %v413_v9  ;;  %v430_v14 = vpop.permute.xlu0 %429 }
 0x4d3   :  { %2967 = vpow2.f32 %v417_v10  ;;  %v506_v15 = vpop.permute.xlu1 %505  ;;  %2681 = vmatpush3.msra.mxu0 %v430_v14 }
 0x4d4   :  { %2969 = vpow2.f32 %v415_v11  ;;  %2686 = vmatpush3.msra.mxu1 %v506_v15  ;;  %2690 = vmatprep.subr.mxu0 %v3023_v54 }
 0x4d5   :  { %2695 = vmatprep.subr.mxu1 %v3023_v54 }
 0x4d7   :  { %v584_v20 = vpop.permute.xlu1 %583 }
 0x4db   :  { %v662_v21 = vpop.permute.xlu1 %661 }
 0x4dd   :  { %v2968_v16 = vpop.eup %2967 }
 0x4de   :  { %v2970_v17 = vpop.eup %2969  ;;  %v422_v18 = vsel %vm255_vm2, %v2968_v16, 0.0 }
 0x4df   :  { %423 = vadd.xlane.f32.xlu1 %v422_v18  ;;  %v419_v19 = vsel %vm255_vm2, %v2970_v17, 0.0 }
 0x4e0   :  { %420 = vadd.xlane.f32.xlu0 %v419_v19 }
 0x4f0   :  { %659 = vrot.lane.b32.xlu1 %v3158_v55, %s3029_s24 }
 0x4f6   :  { %581 = vrot.lane.b32.xlu0 %v3162_v56, %s3029_s24 }
 0x56c   :  { %v424_v22 = vpop.xlane.xlu1 %423 }
 0x56d   :  { %2971 = vrcp.f32 %v424_v22  ;;  %v421_v23 = vpop.xlane.xlu0 %420 }
 0x56e   :  { %2973 = vrcp.f32 %v421_v23 }
 0x570   :  { %v660_v33 = vpop.permute.xlu1 %659 }
 0x571   :  { %v582_v34 = vpop.permute.xlu0 %581 }
 0x577   :  { %v2972_v24 = vpop.eup %2971 }
 0x578   :  { %v2974_v25 = vpop.eup %2973  ;;  %v428_v30 = vmul.f32 %v2972_v24, %v2968_v16 }
 0x579   :  { %v426_v32 = vmul.f32 %v2974_v25, %v2970_v17 }
 0x57a   :  { %2688 = vmatmul.mubr.msk.f32.vlgmr.msra.gmra.mrb[4].mxu1 %vm255_vm2, %v428_v30 }
 0x57b   :  { %2696 = vmatpush3.xpose.msk.msra.mxu1 %vm255_vm2, %v662_v21  ;;  %2683 = vmatmul.mubr.msk.f32.vlgmr.msra.gmra.mrb[4].mxu0 %vm255_vm2, %v426_v32 }
 0x57c   :  { %2691 = vmatpush3.xpose.msk.msra.mxu0 %vm255_vm2, %v584_v20  ;;  %2697 = vmatprep.mubr.msk.f32.mxu1 %vm3024_vm1, %v3023_v54  ;;  %v1007_v20 = vsub.s32 4, %v3133_v39 }
 0x57d   :  { %2692 = vmatprep.mubr.msk.f32.mxu0 %vm3024_vm1, %v3023_v54  ;;  %2705 = vmatprep.subr.mxu1 %v3023_v54 }
 0x57e   :  { %2698 = vmatmul.mubr.msk.f32.vlgmr.msra.gmra.mrb[6].mxu1 %vm255_vm2, %v660_v33  ;;  %2700 = vmatprep.subr.mxu0 %v3023_v54  ;;  %v1008_v21 = vrot.slane %v3141_v42, %v1007_v20 }
 0x57f   :  { %2693 = vmatmul.mubr.msk.f32.vlgmr.msra.gmra.mrb[6].mxu0 %vm255_vm2, %v582_v34  ;;  %2707 = vmatprep.mubr.msk.f32.mxu1 %vm3024_vm1, %v3023_v54 }
 0x580   :  { %2702 = vmatprep.mubr.msk.f32.mxu0 %vm3024_vm1, %v3023_v54 }
 0x64d   :  { %v3216_v35 = vpop.f32.mrb[4].mxu1 }
 0x64e   :  { %v501_v36 = vpop.f32.mrb[4].mxu0  ;;  %v2689_v37 = vpop.f32.mrb[5].mxu1 }
 0x64f   :  { %v2684_v38 = vpop.f32.mrb[5].mxu0 }
 0x651   :  { %v733_v40 = vpop.f32.mrb[6].mxu1 }
 0x652   :  { %v734_v44 = vadd.f32 %v733_v40, %v3178_v61  ;;  %v655_v45 = vpop.f32.mrb[6].mxu0  ;;  %v2699_v46 = vpop.f32.mrb[7].mxu1 }
 0x653   :  { %v656_v47 = vadd.f32 %v655_v45, %v3178_v61  ;;  %v2694_v48 = vpop.f32.mrb[7].mxu0 }
 0x654   :  { %v740_v49 = vsel %vm255_vm2, %v734_v44, -inf }
 0x655   :  { %741 = vmax.xlane.f32.xlu1 %v740_v49  ;;  %v737_v50 = vsel %vm255_vm2, %v656_v47, -inf }
 0x656   :  { %738 = vmax.xlane.f32.xlu0 %v737_v50 }
 0x666   :  { %835 = vrot.lane.b32.xlu1 %v3158_v55, %s3030_s25 }
 0x6e2   :  { %v742_v51 = vpop.xlane.xlu1 %741 }
 0x6e3   :  { %v744_v52 = vsub.f32 %v734_v44, %v742_v51  ;;  %v739_v53 = vpop.xlane.xlu0 %738 }
 0x6e4   :  { %v743_v57 = vsub.f32 %v656_v47, %v739_v53 }
 0x6e5   :  { %v747_v58 = vmul.f32 1.442695, %v744_v52 }
 0x6e6   :  { %v745_v59 = vmul.f32 1.442695, %v743_v57  ;;  %v836_v60 = vpop.permute.xlu1 %835 }
 0x6e7   :  { %2975 = vpow2.f32 %v747_v58  ;;  %2706 = vmatpush3.msra.mxu1 %v836_v60 }
 0x6e8   :  { %2977 = vpow2.f32 %v745_v59 }
 0x6f1   :  { %v2976_v62 = vpop.eup %2975 }
 0x6f2   :  { %v752_v63 = vsel %vm255_vm2, %v2976_v62, 0.0  ;;  %v2978_v0 = vpop.eup %2977 }
 0x6f3   :  { %753 = vadd.xlane.f32.xlu0 %v752_v63  ;;  %v749_v1 = vsel %vm255_vm2, %v2978_v0, 0.0 }
 0x6f7   :  { %750 = vadd.xlane.f32.xlu0 %v749_v1  ;;  %v1045_v1 = vsub.s32 3, %v3133_v39 }
 0x70d   :  { %759 = vrot.lane.b32.xlu0 %v3162_v56, %s3030_s25  ;;  %v123_v56 = vld [vmem:[%s3540_s3 + $0x8] sm:$0xff] }
 0x70e   :  { %v2862_v9 = vpack.c.bf16 %v123_v56, %v122_v8  ;;  %v124_v8 = vld [vmem:[%s3540_s3 + $0x10] sm:$0xff]  ;;  %v125_v56 = vld [vmem:[%s3540_s3 + $0x18] sm:$0xff] }
 0x780   :  { %v754_v55 = vpop.xlane.xlu0 %753 }
 0x781   :  { %2979 = vrcp.f32 %v754_v55 }
 0x784   :  { %v751_v2 = vpop.xlane.xlu0 %750 }
 0x785   :  { %2981 = vrcp.f32 %v751_v2 }
 0x788   :  { %v760_v3 = vpop.permute.xlu0 %759 }
 0x789   :  { %2701 = vmatpush3.msra.mxu0 %v760_v3 }
 0x78a   :  { %2863 = vmatprep.subr.bf16.mxu0 %v2862_v9 }
 0x78b   :  { %v2980_v4 = vpop.eup %2979 }
 0x78c   :  { %v758_v5 = vmul.f32 %v2980_v4, %v2976_v62  ;;  %v1046_v4 = vrot.slane %v3141_v42, %v1045_v1 }
 0x78e   :  { %2708 = vmatmul.mubr.msk.f32.vlgmr.msra.gmra.mrb[8].mxu1 %vm255_vm2, %v758_v5 }
 0x78f   :  { %v2982_v6 = vpop.eup %2981 }
 0x790   :  { %v756_v7 = vmul.f32 %v2982_v6, %v2978_v0  ;;  %v1040_v0 = vrot.slane %v3141_v42, %v3269_v26 }
 0x792   :  { %2703 = vmatmul.mubr.msk.f32.vlgmr.msra.gmra.mrb[8].mxu0 %vm255_vm2, %v756_v7 }
 0x793   :  { %2865 = vmatpush3.bf16.msra.mxu0 %v2862_v9  ;;  %v2874_v9 = vpack.c.bf16 %v125_v56, %v124_v8 }
 0x795   :  { %2875 = vmatprep.subr.bf16.mxu0 %v2874_v9 }
 0x861   :  { %v907_v10 = vpop.f32.mrb[8].mxu1 }
 0x862   :  { %v2709_v11 = vpop.f32.mrb[9].mxu1 }
 0x863   :  { %v127_v11 = vld [vmem:[%s3540_s3 + $0x28] sm:$0xff] }
 0x865   :  { %v831_v14 = vpop.f32.mrb[8].mxu0 }
 0x866   :  { %913 = vrot.lane.b32.xlu1 %v831_v14, %s3031_s30  ;;  %v2704_v15 = vpop.f32.mrb[9].mxu0 }
 0x867   :  { %v128_v15 = vld [vmem:[%s3540_s3 + $0x30] sm:$0xff] }
 0x86a   :  { %915 = vrot.lane.b32.xlu1 %v907_v10, %s3031_s30  ;;  %v126_v10 = vld [vmem:[%s3540_s3 + $0x20] sm:$0xff] }
 0x86b   :  { %v2878_v14 = vpack.c.bf16 %v127_v11, %v126_v10  ;;  %v3358_v11 = vld [vmem:[%s3539_s4 + $0x8] sm:$0xff] }
 0x8d8   :  { %v914_v16 = vpop.permute.xlu1 %913 }
 0x8d9   :  { %v919_v17 = vsel %vm255_vm2, %v501_v36, %v914_v16  ;;  %v129_v16 = vld [vmem:[%s3540_s3 + $0x38] sm:$0xff] }
 0x8da   :  { %2714 = vmatprep.mubr.msk.f32.mxu0 %vm921_vm4, %v919_v17  ;;  %v2882_v17 = vpack.c.bf16 %v129_v16, %v128_v15 }
 0x8dc   :  { %v916_v18 = vpop.permute.xlu1 %915 }
 0x8dd   :  { %v920_v19 = vsel %vm255_vm2, %v3216_v35, %v916_v18  ;;  %v2948_v35 = vpack.i.bf16 %v3129_v31, %v3120_v28  ;;  %v130_v18 = vld [vmem:[%s3540_s3 + $0x40] sm:$0xff] }
 0x8de   :  { %2715 = vmatmul.mubr.msk.f32.vlgmr.msra.gmra.mrb[10].mxu0 %vm921_vm4, %v920_v19  ;;  %v131_v19 = vld [vmem:[%s3540_s3 + $0x48] sm:$0xff] }
 0x8df   :  { %2877 = vmatpush3.bf16.msra.mxu0 %v2874_v9 }
 0x8e0   :  { %2879 = vmatprep.subr.bf16.mxu0 %v2878_v14 }
 0x8e3   :  { %2881 = vmatpush3.bf16.msra.mxu0 %v2878_v14  ;;  %v1297_v14 = vrot.slane %v3358_v11, %v3136_v41 }
 0x8e4   :  { %2883 = vmatprep.subr.bf16.mxu0 %v2882_v17 }
 0x8e7   :  { %2885 = vmatpush3.bf16.msra.mxu0 %v2882_v17 }
 0x9b1   :  { %v2716_v22 = vpop.f32.mrb[10].mxu0 }
 0x9b2   :  { %v1004_v23 = vadd.f32 %v2716_v22, %v3097_v13  ;;  %v994_v24 = vpop.f32.mrb[11].mxu0  ;;  %v1051_v22 = vsub.s32 6, %v3133_v39 }
 0x9b3   :  { %v1003_v25 = vadd.f32 %v994_v24, %v3095_v12 }
 0x9b4   :  { %v3249_v30 = vadd.f32 %v1008_v21, %v1004_v23  ;;  %v1052_v23 = vrot.slane %v3141_v42, %v1051_v22 }
 0x9b5   :  { %v3251_v32 = vadd.f32 %v1008_v21, %v1003_v25  ;;  %v2886_v21 = vpack.c.bf16 %v131_v19, %v130_v18  ;;  %v1303_v19 = vrot.slane %v3358_v11, %v3144_v43 }
 0x9b6   :  { %v1014_v33 = vsel %vm31_vm0, %v3249_v30, 0.0 }
 0x9b7   :  { %1015 = vadd.xlane.f32.xlu1 %v1014_v33  ;;  %v1011_v34 = vsel %vm31_vm0, %v3251_v32, 0.0  ;;  %2887 = vmatprep.subr.bf16.mxu0 %v2886_v21 }
 0x9b8   :  { %1012 = vadd.xlane.f32.xlu0 %v1011_v34  ;;  %2889 = vmatpush3.bf16.msra.mxu0 %v2886_v21 }
 0x9b9   :  { %2763 = vmatprep.subr.mxu0 %v3023_v54 }
 0x9c8   :  { %2949 = vrot.lane.b32.xlu1 %v2948_v35, %s3032_s7 }
 0xa44   :  { %v1016_v13 = vpop.xlane.xlu1 %1015 }
 0xa45   :  { %v1018_v12 = vmul.f32 0.03125, %v1016_v13  ;;  %v1013_v36 = vpop.xlane.xlu0 %1012 }
 0xa46   :  { %v1017_v37 = vmul.f32 0.03125, %v1013_v36 }
 0xa47   :  { %v1020_v38 = vsub.f32 %v3249_v30, %v1018_v12 }
 0xa48   :  { %v1019_v40 = vsub.f32 %v3251_v32, %v1017_v37  ;;  %v2950_v50 = vpop.permute.xlu1 %2949 }
 0xa49   :  { %v1022_v44 = vmul.f32 %v1020_v38, %v1020_v38  ;;  %v2952_v53 = vunpack.i.h.bf16 %v2950_v50  ;;  %v2951_v57 = vunpack.i.l.bf16 %v2950_v50 }
 0xa4a   :  { %v1021_v46 = vmul.f32 %v1019_v40, %v1019_v40 }
 0xa4b   :  { %v1026_v45 = vsel %vm31_vm0, %v1022_v44, 0.0  ;;  %v2870_v63 = vpack.c.bf16 %v2952_v53, %v2951_v57 }
 0xa4c   :  { %1027 = vadd.xlane.f32.xlu0 %v1026_v45  ;;  %v1023_v47 = vsel %vm31_vm0, %v1021_v46, 0.0 }
 0xa50   :  { %1024 = vadd.xlane.f32.xlu0 %v1023_v47  ;;  %v1246_v47 = vsub.s32 5, %v3133_v39 }
 0xa66   :  { %2944 = vrot.lane.b32.xlu0 %v2943_v29, %s3032_s7 }
 0xad9   :  { %v1028_v28 = vpop.xlane.xlu0 %1027 }
 0xada   :  { %v1030_v31 = vmul.f32 0.03125, %v1028_v28  ;;  %v1247_v28 = vrot.slane %v3141_v42, %v1246_v47 }
 0xadc   :  { %v1032_v48 = vadd.f32 1e-05, %v1030_v31 }
 0xadd   :  { %v1025_v49 = vpop.xlane.xlu0 %1024 }
 0xade   :  { %2983 = vrsqrt.f32 %v1032_v48  ;;  %v1029_v51 = vmul.f32 0.03125, %v1025_v49 }
 0xae0   :  { %v1031_v52 = vadd.f32 1e-05, %v1029_v51 }
 0xae1   :  { %v2945_v58 = vpop.permute.xlu0 %2944 }
 0xae2   :  { %2985 = vrsqrt.f32 %v1031_v52  ;;  %v2947_v59 = vunpack.i.h.bf16 %v2945_v58  ;;  %v2946_v60 = vunpack.i.l.bf16 %v2945_v58 }
 0xae4   :  { %v2866_v62 = vpack.c.bf16 %v2947_v59, %v2946_v60 }
 0xae6   :  { %2867 = vmatprep.subr.bf16.mxu1 %v2866_v62 }
 0xae7   :  { %2869 = vmatpush3.bf16.msra.mxu1 %v2866_v62 }
 0xae8   :  { %v2984_v27 = vpop.eup %2983  ;;  %2871 = vmatprep.subr.bf16.mxu1 %v2870_v63 }
 0xae9   :  { %v1036_v29 = vmul.f32 %v2984_v27, %v1020_v38 }
 0xaeb   :  { %2873 = vmatpush3.bf16.msra.mxu1 %v2870_v63  ;;  %v1042_v3 = vmul.f32 %v1040_v0, %v1036_v29 }
 0xaec   :  { %v2986_v55 = vpop.eup %2985 }
 0xaed   :  { %v1035_v2 = vmul.f32 %v2986_v55, %v1019_v40  ;;  %v1048_v7 = vadd.f32 %v1046_v4, %v1042_v3  ;;  %v3338_v55 = vld [vmem:[%s3538_s2 + $0x28] sm:$0xff]  ;;  %v3345_v3 = vld [vmem:[%s3538_s2 + $0x30] sm:$0xff] }
 0xaef   :  { %v1041_v5 = vmul.f32 %v1040_v0, %v1035_v2  ;;  %v3333_v0 = vld [vmem:[%s3538_s2 + $0x20] sm:$0xff] }
 0xaf0   :  { %v2890_v2 = vpack.c.bf16 %v3338_v55, %v3333_v0 }
 0xaf1   :  { %v1047_v6 = vadd.f32 %v1046_v4, %v1041_v5  ;;  %v3350_v4 = vld [vmem:[%s3538_s2 + $0x38] sm:$0xff] }
 0xaf2   :  { %2891 = vmatprep.subr.bf16.mxu1 %v2890_v2  ;;  %v2894_v5 = vpack.c.bf16 %v3350_v4, %v3345_v3 }
 0xaf3   :  { %2725 = vmatprep.mubr.msk.f32.mxu1 %vm31_vm0, %v1047_v6 }
 0xaf4   :  { %2726 = vmatmul.mubr.msk.f32.vlgmr.msra.gmra.mrb[10].mxu1 %vm31_vm0, %v1048_v7 }
 0xaf5   :  { %2893 = vmatpush3.bf16.msra.mxu1 %v2890_v2 }
 0xaf6   :  { %2895 = vmatprep.subr.bf16.mxu1 %v2894_v5 }
 0xaf9   :  { %2897 = vmatpush3.bf16.msra.mxu1 %v2894_v5 }
 0xafa   :  { %2758 = vmatprep.subr.mxu1 %v3023_v54 }
 0xbc7   :  { %v2727_v24 = vpop.f32.mrb[10].mxu1 }
 0xbc8   :  { %v1147_v25 = vadd.f32 %v2727_v24, %v1052_v23  ;;  %v1141_v33 = vpop.f32.mrb[11].mxu1 }
 0xbc9   :  { %v1142_v34 = vadd.f32 %v1141_v33, %v1052_v23 }
 0xbca   :  { %v1153_v35 = vmul.f32 0.70710677, %v1147_v25  ;;  %v1151_v44 = vmul.f32 0.5, %v1147_v25 }
 0xbcb   :  { %v1152_v13 = vmul.f32 0.70710677, %v1142_v34  ;;  %v1150_v38 = vmul.f32 0.5, %v1142_v34 }
 0xbcc   :  { %2987 = verf.f32 %v1153_v35 }
 0xbcd   :  { %2989 = verf.f32 %v1152_v13 }
 0xbd6   :  { %v2988_v12 = vpop.eup %2987 }
 0xbd7   :  { %v2990_v36 = vpop.eup %2989  ;;  %v1157_v37 = vadd.f32 1.0, %v2988_v12 }
 0xbd8   :  { %v1156_v40 = vadd.f32 1.0, %v2990_v36 }
 0xbd9   :  { %v1159_v46 = vmul.f32 %v1157_v37, %v1151_v44 }
 0xbda   :  { %v1158_v45 = vmul.f32 %v1156_v40, %v1150_v38 }
 0xbdc   :  { %2744 = vmatprep.mubr.msk.f32.mxu0 %vm1160_vm5, %v1158_v45 }
 0xbdd   :  { %2745 = vmatmul.mubr.msk.f32.vlgmr.msra.gmra.mrb[12].mxu0 %vm1160_vm5, %v1159_v46 }
 0xbde   :  { %2765 = vmatprep.mubr.msk.f32.mxu0 %vm3024_vm1, %v3023_v54 }
 0xcb0   :  { %v2746_v31 = vpop.f32.mrb[12].mxu0 }
 0xcb1   :  { %v1243_v48 = vadd.f32 %v2746_v31, %v3249_v30  ;;  %v1233_v49 = vpop.f32.mrb[13].mxu0 }
 0xcb2   :  { %v1242_v50 = vadd.f32 %v1233_v49, %v3251_v32 }
 0xcb3   :  { %v3318_v51 = vadd.f32 %v1247_v28, %v1243_v48 }
 0xcb4   :  { %v3320_v52 = vadd.f32 %v1247_v28, %v1242_v50 }
 0xcb5   :  { %v1271_v53 = vsel %vm31_vm0, %v3318_v51, 0.0 }
 0xcb6   :  { %1272 = vadd.xlane.f32.xlu0 %v1271_v53  ;;  %v1268_v57 = vsel %vm31_vm0, %v3320_v52, 0.0 }
 0xcb7   :  { %1269 = vadd.xlane.f32.xlu1 %v1268_v57 }
 0xd43   :  { %v1273_v58 = vpop.xlane.xlu0 %1272 }
 0xd44   :  { %v1275_v42 = vmul.f32 0.03125, %v1273_v58  ;;  %v1270_v59 = vpop.xlane.xlu1 %1269 }
 0xd45   :  { %v1274_v60 = vmul.f32 0.03125, %v1270_v59 }
 0xd46   :  { %v1277_v30 = vsub.f32 %v3318_v51, %v1275_v42 }
 0xd47   :  { %v1276_v32 = vsub.f32 %v3320_v52, %v1274_v60 }
 0xd48   :  { %v1279_v62 = vmul.f32 %v1277_v30, %v1277_v30 }
 0xd49   :  { %v1278_v63 = vmul.f32 %v1276_v32, %v1276_v32 }
 0xd4a   :  { %v1283_v27 = vsel %vm31_vm0, %v1279_v62, 0.0 }
 0xd4b   :  { %1284 = vadd.xlane.f32.xlu1 %v1283_v27  ;;  %v1280_v29 = vsel %vm31_vm0, %v1278_v63, 0.0 }
 0xd4c   :  { %1281 = vadd.xlane.f32.xlu0 %v1280_v29 }
 0xdd8   :  { %v1285_v6 = vpop.xlane.xlu1 %1284 }
 0xdd9   :  { %v1287_v7 = vmul.f32 0.03125, %v1285_v6  ;;  %v1282_v8 = vpop.xlane.xlu0 %1281 }
 0xdda   :  { %v1286_v56 = vmul.f32 0.03125, %v1282_v8 }
 0xddb   :  { %v1289_v9 = vadd.f32 1e-05, %v1287_v7 }
 0xddc   :  { %v1288_v10 = vadd.f32 1e-05, %v1286_v56 }
 0xddd   :  { %2991 = vrsqrt.f32 %v1289_v9 }
 0xdde   :  { %2993 = vrsqrt.f32 %v1288_v10 }
 0xde7   :  { %v2992_v15 = vpop.eup %2991 }
 0xde8   :  { %v2994_v16 = vpop.eup %2993  ;;  %v1293_v17 = vmul.f32 %v2992_v15, %v1277_v30 }
 0xde9   :  { %v1292_v18 = vmul.f32 %v2994_v16, %v1276_v32 }
 0xdea   :  { %v1299_v21 = vmul.f32 %v1297_v14, %v1293_v17 }
 0xdeb   :  { %v1298_v23 = vmul.f32 %v1297_v14, %v1292_v18 }
 0xdec   :  { %v1305_v25 = vadd.f32 %v1303_v19, %v1299_v21 }
 0xded   :  { %v1304_v24 = vadd.f32 %v1303_v19, %v1298_v23 }
 0xdef   :  { %2755 = vmatprep.mubr.msk.f32.mxu1 %vm31_vm0, %v1304_v24 }
 0xdf0   :  { %2756 = vmatmul.mubr.msk.f32.vlgmr.msra.gmra.mrb[12].mxu1 %vm31_vm0, %v1305_v25 }
 0xdf1   :  { %2760 = vmatprep.mubr.msk.f32.mxu1 %vm3024_vm1, %v3023_v54 }
 0xec3   :  { %v3368_v33 = vpop.f32.mrb[12].mxu1 }
 0xec4   :  { %1465 = vrot.lane.b32.xlu1 %v3368_v33, %s3025_s21  ;;  %v3372_v34 = vpop.f32.mrb[13].mxu1 }
 0xec5   :  { %1388 = vrot.lane.b32.xlu0 %v3372_v34, %s3025_s21 }
 0xf36   :  { %v1466_v35 = vpop.permute.xlu1 %1465 }
 0xf37   :  { %2764 = vmatpush3.xpose.msk.msra.mxu0 %vm255_vm2, %v1466_v35  ;;  %v1389_v13 = vpop.permute.xlu0 %1388 }
 0xf38   :  { %2759 = vmatpush3.xpose.msk.msra.mxu1 %vm255_vm2, %v1389_v13  ;;  %2773 = vmatprep.subr.mxu0 %v3023_v54 }
 0xf39   :  { %2768 = vmatprep.subr.mxu1 %v3023_v54 }
 0xf3a   :  { %2766 = vmatmul.mubr.msk.f32.vlgmr.msra.gmra.mrb[14].mxu0 %vm255_vm2, %v3368_v33 }
 0xf3b   :  { %2761 = vmatmul.mubr.msk.f32.vlgmr.msra.gmra.mrb[14].mxu1 %vm255_vm2, %v3372_v34  ;;  %2775 = vmatprep.mubr.msk.f32.mxu0 %vm3024_vm1, %v3023_v54 }
 0xf3c   :  { %2770 = vmatprep.mubr.msk.f32.mxu1 %vm3024_vm1, %v3023_v54 }
0x100d   :  { %v1537_v12 = vpop.f32.mrb[14].mxu0 }
0x100e   :  { %v1538_v36 = vadd.f32 %v1537_v12, %v3178_v61  ;;  %v1460_v37 = vpop.f32.mrb[14].mxu1  ;;  %v2767_v38 = vpop.f32.mrb[15].mxu0 }
0x100f   :  { %v1461_v40 = vadd.f32 %v1460_v37, %v3178_v61  ;;  %v2762_v44 = vpop.f32.mrb[15].mxu1 }
0x1010   :  { %v1544_v45 = vsel %vm255_vm2, %v1538_v36, -inf }
0x1011   :  { %1545 = vmax.xlane.f32.xlu0 %v1544_v45  ;;  %v1541_v46 = vsel %vm255_vm2, %v1461_v40, -inf }
0x1012   :  { %1542 = vmax.xlane.f32.xlu1 %v1541_v46 }
0x1023   :  { %1639 = vrot.lane.b32.xlu1 %v3368_v33, %s3027_s22 }
0x1027   :  { %1563 = vrot.lane.b32.xlu0 %v3372_v34, %s3027_s22  ;;  %1717 = vrot.lane.b32.xlu1 %v3372_v34, %s3028_s23 }
0x102b   :  { %1795 = vrot.lane.b32.xlu1 %v3368_v33, %s3028_s23 }
0x109e   :  { %v1546_v28 = vpop.xlane.xlu0 %1545 }
0x109f   :  { %v1548_v31 = vsub.f32 %v1538_v36, %v1546_v28  ;;  %v1543_v48 = vpop.xlane.xlu1 %1542 }
0x10a0   :  { %v1547_v49 = vsub.f32 %v1461_v40, %v1543_v48 }
0x10a1   :  { %v1551_v50 = vmul.f32 1.442695, %v1548_v31 }
0x10a2   :  { %v1549_v53 = vmul.f32 1.442695, %v1547_v49  ;;  %v1564_v57 = vpop.permute.xlu0 %1563 }
0x10a3   :  { %2995 = vpow2.f32 %v1551_v50  ;;  %v1640_v58 = vpop.permute.xlu1 %1639  ;;  %2769 = vmatpush3.msra.mxu1 %v1564_v57 }
0x10a4   :  { %2997 = vpow2.f32 %v1549_v53  ;;  %2774 = vmatpush3.msra.mxu0 %v1640_v58  ;;  %2778 = vmatprep.subr.mxu1 %v3023_v54  ;;  %v2522_v53 = vld [vmem:[%s3540_s3 + $0x50] sm:$0xff] }
0x10a5   :  { %2783 = vmatprep.subr.mxu0 %v3023_v54 }
0x10a7   :  { %v1718_v32 = vpop.permute.xlu1 %1717 }
0x10ab   :  { %v1796_v62 = vpop.permute.xlu1 %1795 }
0x10ad   :  { %v2996_v42 = vpop.eup %2995 }
0x10ae   :  { %v2998_v59 = vpop.eup %2997  ;;  %v1556_v60 = vsel %vm255_vm2, %v2996_v42, 0.0 }
0x10af   :  { %1557 = vadd.xlane.f32.xlu1 %v1556_v60  ;;  %v1553_v30 = vsel %vm255_vm2, %v2998_v59, 0.0 }
0x10b0   :  { %1554 = vadd.xlane.f32.xlu0 %v1553_v30 }
0x10c0   :  { %1793 = vrot.lane.b32.xlu1 %v3368_v33, %s3029_s24 }
0x10c6   :  { %1715 = vrot.lane.b32.xlu0 %v3372_v34, %s3029_s24 }
0x113c   :  { %v1558_v63 = vpop.xlane.xlu1 %1557 }
0x113d   :  { %2999 = vrcp.f32 %v1558_v63  ;;  %v1555_v27 = vpop.xlane.xlu0 %1554 }
0x113e   :  { %3001 = vrcp.f32 %v1555_v27  ;;  %v2141_v27 = vrot.slane %v3358_v11, %v1007_v20  ;;  %v2958_v20 = vpack.i.bf16 %v3350_v4, %v3345_v3  ;;  %v2953_v3 = vpack.i.bf16 %v3338_v55, %v3333_v0 }
0x1140   :  { %v1794_v7 = vpop.permute.xlu1 %1793 }
0x1141   :  { %v1716_v8 = vpop.permute.xlu0 %1715 }
0x1147   :  { %v3000_v29 = vpop.eup %2999 }
0x1148   :  { %v3002_v2 = vpop.eup %3001  ;;  %v1562_v5 = vmul.f32 %v3000_v29, %v2996_v42 }
0x1149   :  { %v1560_v6 = vmul.f32 %v3002_v2, %v2998_v59 }
0x114a   :  { %2776 = vmatmul.mubr.msk.f32.vlgmr.msra.gmra.mrb[16].mxu0 %vm255_vm2, %v1562_v5 }
0x114b   :  { %2784 = vmatpush3.xpose.msk.msra.mxu0 %vm255_vm2, %v1796_v62  ;;  %2771 = vmatmul.mubr.msk.f32.vlgmr.msra.gmra.mrb[16].mxu1 %vm255_vm2, %v1560_v6 }
0x114c   :  { %2779 = vmatpush3.xpose.msk.msra.mxu1 %vm255_vm2, %v1718_v32  ;;  %2785 = vmatprep.mubr.msk.f32.mxu0 %vm3024_vm1, %v3023_v54 }
0x114d   :  { %2780 = vmatprep.mubr.msk.f32.mxu1 %vm3024_vm1, %v3023_v54  ;;  %2793 = vmatprep.subr.mxu0 %v3023_v54 }
0x114e   :  { %2786 = vmatmul.mubr.msk.f32.vlgmr.msra.gmra.mrb[18].mxu0 %vm255_vm2, %v1794_v7  ;;  %2788 = vmatprep.subr.mxu1 %v3023_v54 }
0x114f   :  { %2781 = vmatmul.mubr.msk.f32.vlgmr.msra.gmra.mrb[18].mxu1 %vm255_vm2, %v1716_v8  ;;  %2795 = vmatprep.mubr.msk.f32.mxu0 %vm3024_vm1, %v3023_v54 }
0x1150   :  { %2790 = vmatprep.mubr.msk.f32.mxu1 %vm3024_vm1, %v3023_v54 }
0x121d   :  { %v1711_v56 = vpop.f32.mrb[16].mxu0 }
0x121e   :  { %v1635_v9 = vpop.f32.mrb[16].mxu1  ;;  %v2777_v10 = vpop.f32.mrb[17].mxu0 }
0x121f   :  { %v2772_v14 = vpop.f32.mrb[17].mxu1 }
0x1221   :  { %v1867_v15 = vpop.f32.mrb[18].mxu0 }
0x1222   :  { %v1868_v16 = vadd.f32 %v1867_v15, %v3178_v61  ;;  %v1789_v17 = vpop.f32.mrb[18].mxu1  ;;  %v2787_v18 = vpop.f32.mrb[19].mxu0 }
0x1223   :  { %v1790_v19 = vadd.f32 %v1789_v17, %v3178_v61  ;;  %v2782_v21 = vpop.f32.mrb[19].mxu1 }
0x1224   :  { %v1874_v23 = vsel %vm255_vm2, %v1868_v16, -inf }
0x1225   :  { %1875 = vmax.xlane.f32.xlu1 %v1874_v23  ;;  %v1871_v24 = vsel %vm255_vm2, %v1790_v19, -inf }
0x1226   :  { %1872 = vmax.xlane.f32.xlu0 %v1871_v24 }
0x1236   :  { %1969 = vrot.lane.b32.xlu1 %v3368_v33, %s3030_s25 }
0x12b2   :  { %v1876_v25 = vpop.xlane.xlu1 %1875 }
0x12b3   :  { %v1878_v35 = vsub.f32 %v1868_v16, %v1876_v25  ;;  %v1873_v13 = vpop.xlane.xlu0 %1872 }
0x12b4   :  { %v1877_v12 = vsub.f32 %v1790_v19, %v1873_v13 }
0x12b5   :  { %v1881_v36 = vmul.f32 1.442695, %v1878_v35 }
0x12b6   :  { %v1879_v37 = vmul.f32 1.442695, %v1877_v12  ;;  %v1970_v38 = vpop.permute.xlu1 %1969 }
0x12b7   :  { %3003 = vpow2.f32 %v1881_v36  ;;  %2794 = vmatpush3.msra.mxu0 %v1970_v38 }
0x12b8   :  { %3005 = vpow2.f32 %v1879_v37 }
0x12c1   :  { %v3004_v61 = vpop.eup %3003 }
0x12c2   :  { %v1886_v40 = vsel %vm255_vm2, %v3004_v61, 0.0  ;;  %v3006_v44 = vpop.eup %3005 }
0x12c3   :  { %1887 = vadd.xlane.f32.xlu0 %v1886_v40  ;;  %v1883_v45 = vsel %vm255_vm2, %v3006_v44, 0.0 }
0x12c7   :  { %1884 = vadd.xlane.f32.xlu0 %v1883_v45 }
0x12dd   :  { %1893 = vrot.lane.b32.xlu0 %v3372_v34, %s3030_s25  ;;  %v2523_v34 = vld [vmem:[%s3540_s3 + $0x58] sm:$0xff] }
0x12de   :  { %v2898_v57 = vpack.c.bf16 %v2523_v34, %v2522_v53  ;;  %v2524_v34 = vld [vmem:[%s3540_s3 + $0x60] sm:$0xff] }
0x1350   :  { %v1888_v33 = vpop.xlane.xlu0 %1887 }
0x1351   :  { %3007 = vrcp.f32 %v1888_v33  ;;  %v2173_v33 = vrot.slane %v3358_v11, %v3269_v26 }
0x1354   :  { %v1885_v46 = vpop.xlane.xlu0 %1884 }
0x1355   :  { %3009 = vrcp.f32 %v1885_v46 }
0x1358   :  { %v1894_v28 = vpop.permute.xlu0 %1893 }
0x1359   :  { %2789 = vmatpush3.msra.mxu1 %v1894_v28 }
0x135a   :  { %2899 = vmatprep.subr.bf16.mxu1 %v2898_v57 }
0x135b   :  { %v3008_v31 = vpop.eup %3007 }
0x135c   :  { %v1892_v48 = vmul.f32 %v3008_v31, %v3004_v61 }
0x135e   :  { %2796 = vmatmul.mubr.msk.f32.vlgmr.msra.gmra.mrb[20].mxu0 %vm255_vm2, %v1892_v48  ;;  %v2179_v48 = vrot.slane %v3358_v11, %v1045_v1  ;;  %v2526_v1 = vld [vmem:[%s3540_s3 + $0x70] sm:$0xff] }
0x135f   :  { %v3010_v49 = vpop.eup %3009 }
0x1360   :  { %v1890_v50 = vmul.f32 %v3010_v49, %v3006_v44 }
0x1362   :  { %2791 = vmatmul.mubr.msk.f32.vlgmr.msra.gmra.mrb[20].mxu1 %vm255_vm2, %v1890_v50 }
0x1363   :  { %2901 = vmatpush3.bf16.msra.mxu1 %v2898_v57  ;;  %v2525_v57 = vld [vmem:[%s3540_s3 + $0x68] sm:$0xff] }
0x1431   :  { %v2041_v58 = vpop.f32.mrb[20].mxu0 }
0x1432   :  { %v2797_v42 = vpop.f32.mrb[21].mxu0 }
0x1433   :  { %v2527_v42 = vld [vmem:[%s3540_s3 + $0x78] sm:$0xff] }
0x1435   :  { %v1965_v59 = vpop.f32.mrb[20].mxu1 }
0x1436   :  { %2047 = vrot.lane.b32.xlu1 %v1965_v59, %s3031_s30  ;;  %v2792_v60 = vpop.f32.mrb[21].mxu1  ;;  %v2528_v59 = vld [vmem:[%s3540_s3 + $0x80] sm:$0xff] }
0x1437   :  { %v2529_v60 = vld [vmem:[%s3540_s3 + $0x88] sm:$0xff] }
0x143a   :  { %2049 = vrot.lane.b32.xlu1 %v2041_v58, %s3031_s30  ;;  %v2910_v58 = vpack.c.bf16 %v2525_v57, %v2524_v34 }
0x143c   :  { %2911 = vmatprep.subr.bf16.mxu1 %v2910_v58 }
0x14a8   :  { %v2048_v30 = vpop.permute.xlu1 %2047 }
0x14a9   :  { %v2053_v32 = vsel %vm255_vm2, %v1635_v9, %v2048_v30  ;;  %v2918_v30 = vpack.c.bf16 %v2529_v60, %v2528_v59 }
0x14aa   :  { %2802 = vmatprep.mubr.msk.f32.mxu1 %vm921_vm4, %v2053_v32  ;;  %v2530_v32 = vld [vmem:[%s3540_s3 + $0x90] sm:$0xff] }
0x14ac   :  { %v2050_v62 = vpop.permute.xlu1 %2049 }
0x14ad   :  { %v2054_v63 = vsel %vm255_vm2, %v1711_v56, %v2050_v62  ;;  %v2531_v62 = vld [vmem:[%s3540_s3 + $0x98] sm:$0xff] }
0x14ae   :  { %2803 = vmatmul.mubr.msk.f32.vlgmr.msra.gmra.mrb[22].mxu1 %vm921_vm4, %v2054_v63  ;;  %v2922_v63 = vpack.c.bf16 %v2531_v62, %v2530_v32 }
0x14af   :  { %2913 = vmatpush3.bf16.msra.mxu1 %v2910_v58 }
0x1581   :  { %v2804_v29 = vpop.f32.mrb[22].mxu1 }
0x1582   :  { %v2137_v2 = vadd.f32 %v2804_v29, %v3318_v51  ;;  %v2127_v5 = vpop.f32.mrb[23].mxu1 }
0x1583   :  { %v2136_v6 = vadd.f32 %v2127_v5, %v3320_v52 }
0x1584   :  { %v3453_v7 = vadd.f32 %v2141_v27, %v2137_v2 }
0x1585   :  { %v3455_v8 = vadd.f32 %v2141_v27, %v2136_v6  ;;  %v2185_v27 = vrot.slane %v3358_v11, %v1051_v22  ;;  %v2382_v22 = vld [vmem:[%s3541_s5] sm:$0xff] }
0x1586   :  { %v2147_v9 = vsel %vm31_vm0, %v3453_v7, 0.0 }
0x1587   :  { %2148 = vadd.xlane.f32.xlu1 %v2147_v9  ;;  %v2144_v56 = vsel %vm31_vm0, %v3455_v8, 0.0 }
0x1588   :  { %2145 = vadd.xlane.f32.xlu0 %v2144_v56 }
0x1598   :  { %2959 = vrot.lane.b32.xlu1 %v2958_v20, %s3032_s7 }
0x1614   :  { %v2149_v51 = vpop.xlane.xlu1 %2148 }
0x1615   :  { %v2151_v10 = vmul.f32 0.03125, %v2149_v51  ;;  %v2146_v52 = vpop.xlane.xlu0 %2145 }
0x1616   :  { %v2150_v14 = vmul.f32 0.03125, %v2146_v52 }
0x1617   :  { %v2153_v15 = vsub.f32 %v3453_v7, %v2151_v10 }
0x1618   :  { %v2152_v16 = vsub.f32 %v3455_v8, %v2150_v14  ;;  %v2960_v35 = vpop.permute.xlu1 %2959 }
0x1619   :  { %v2155_v17 = vmul.f32 %v2153_v15, %v2153_v15  ;;  %v2962_v36 = vunpack.i.h.bf16 %v2960_v35  ;;  %v2961_v37 = vunpack.i.l.bf16 %v2960_v35 }
0x161a   :  { %v2154_v19 = vmul.f32 %v2152_v16, %v2152_v16 }
0x161b   :  { %v2159_v18 = vsel %vm31_vm0, %v2155_v17, 0.0  ;;  %v2906_v45 = vpack.c.bf16 %v2962_v36, %v2961_v37 }
0x161c   :  { %2160 = vadd.xlane.f32.xlu0 %v2159_v18  ;;  %v2156_v21 = vsel %vm31_vm0, %v2154_v19, 0.0  ;;  %v2383_v18 = vld [vmem:[%s3541_s5 + $0x8] sm:$0xff] }
0x161d   :  { %v2927_v19 = vpack.c.bf16 %v2383_v18, %v2382_v22 }
0x1620   :  { %2157 = vadd.xlane.f32.xlu0 %v2156_v21  ;;  %v3033_v21 = vmov 0.0|0.0  }
0x1636   :  { %2954 = vrot.lane.b32.xlu0 %v2953_v3, %s3032_s7  ;;  %v2384_v3 = vld [vmem:[%s3541_s5 + $0x10] sm:$0xff] }
0x16a9   :  { %v2161_v4 = vpop.xlane.xlu0 %2160 }
0x16aa   :  { %v2163_v23 = vmul.f32 0.03125, %v2161_v4  ;;  %v2385_v4 = vld [vmem:[%s3541_s5 + $0x18] sm:$0xff] }
0x16ac   :  { %v2165_v24 = vadd.f32 1e-05, %v2163_v23  ;;  %v2930_v23 = vpack.c.bf16 %v2385_v4, %v2384_v3 }
0x16ad   :  { %v2158_v25 = vpop.xlane.xlu0 %2157 }
0x16ae   :  { %3011 = vrsqrt.f32 %v2165_v24  ;;  %v2162_v13 = vmul.f32 0.03125, %v2158_v25  ;;  %v2379_v24 = vrot.slane %v3358_v11, %v1246_v47 }
0x16b0   :  { %v2164_v12 = vadd.f32 1e-05, %v2162_v13 }
0x16b1   :  { %v2955_v38 = vpop.permute.xlu0 %2954 }
0x16b2   :  { %3013 = vrsqrt.f32 %v2164_v12  ;;  %v2957_v61 = vunpack.i.h.bf16 %v2955_v38  ;;  %v2956_v40 = vunpack.i.l.bf16 %v2955_v38 }
0x16b4   :  { %v2902_v44 = vpack.c.bf16 %v2957_v61, %v2956_v40  ;;  %v2386_v40 = vld [vmem:[%s3541_s5 + $0x20] sm:$0xff] }
0x16b5   :  { %v2390_v39 = vrot.slane %v2386_v40, %v3136_v41 }
0x16b6   :  { %2903 = vmatprep.subr.bf16.mxu0 %v2902_v44 }
0x16b7   :  { %2905 = vmatpush3.bf16.msra.mxu0 %v2902_v44 }
0x16b8   :  { %v3012_v0 = vpop.eup %3011  ;;  %2907 = vmatprep.subr.bf16.mxu0 %v2906_v45 }
0x16b9   :  { %v2169_v55 = vmul.f32 %v3012_v0, %v2153_v15 }
0x16bb   :  { %2909 = vmatpush3.bf16.msra.mxu0 %v2906_v45  ;;  %v2175_v31 = vmul.f32 %v2173_v33, %v2169_v55  ;;  %v2481_v55 = vrot.slane %v2386_v40, %v3269_v26 }
0x16bc   :  { %v3014_v46 = vpop.eup %3013  ;;  %2926 = vmatprep.subr.bf16.mxu0 %v3033_v21 }
0x16bd   :  { %v2168_v28 = vmul.f32 %v3014_v46, %v2152_v16  ;;  %v2181_v53 = vadd.f32 %v2179_v48, %v2175_v31 }
0x16bf   :  { %v2174_v49 = vmul.f32 %v2173_v33, %v2168_v28 }
0x16c1   :  { %v2180_v50 = vadd.f32 %v2179_v48, %v2174_v49 }
0x16c3   :  { %2813 = vmatprep.mubr.msk.f32.mxu0 %vm31_vm0, %v2180_v50 }
0x16c4   :  { %2814 = vmatmul.mubr.msk.f32.vlgmr.msra.gmra.mrb[22].mxu0 %vm31_vm0, %v2181_v53 }
0x16c5   :  { %2843 = vmatprep.mubr.msk.f32.mxu0 %vm3024_vm1, %v3023_v54  ;;  %v2914_v54 = vpack.c.bf16 %v2527_v42, %v2526_v1  ;;  %2928 = vmatpush3.bf16.msra.mxu0 %v2927_v19 }
0x16c6   :  { %2929 = vmatprep.subr.bf16.mxu0 %v3033_v21 }
0x16c7   :  { %2915 = vmatprep.subr.bf16.mxu1 %v2914_v54 }
0x16c8   :  { %2917 = vmatpush3.bf16.msra.mxu1 %v2914_v54 }
0x16c9   :  { %2919 = vmatprep.subr.bf16.mxu1 %v2918_v30  ;;  %2931 = vmatpush3.bf16.msra.mxu0 %v2930_v23 }
0x16cc   :  { %2921 = vmatpush3.bf16.msra.mxu1 %v2918_v30 }
0x16cd   :  { %2923 = vmatprep.subr.bf16.mxu1 %v2922_v63 }
0x16d0   :  { %2925 = vmatpush3.bf16.msra.mxu1 %v2922_v63 }
0x1797   :  { %v2815_v29 = vpop.f32.mrb[22].mxu0 }
0x1798   :  { %v2280_v2 = vadd.f32 %v2815_v29, %v2185_v27  ;;  %v2274_v5 = vpop.f32.mrb[23].mxu0 }
0x1799   :  { %v2275_v6 = vadd.f32 %v2274_v5, %v2185_v27 }
0x179a   :  { %v2286_v9 = vmul.f32 0.70710677, %v2280_v2  ;;  %v2284_v15 = vmul.f32 0.5, %v2280_v2 }
0x179b   :  { %v2285_v56 = vmul.f32 0.70710677, %v2275_v6  ;;  %v2283_v52 = vmul.f32 0.5, %v2275_v6 }
0x179c   :  { %3015 = verf.f32 %v2286_v9 }
0x179d   :  { %3017 = verf.f32 %v2285_v56 }
0x17a6   :  { %v3016_v20 = vpop.eup %3015 }
0x17a7   :  { %v3018_v51 = vpop.eup %3017  ;;  %v2290_v10 = vadd.f32 1.0, %v3016_v20 }
0x17a8   :  { %v2289_v14 = vadd.f32 1.0, %v3018_v51 }
0x17a9   :  { %v2292_v17 = vmul.f32 %v2290_v10, %v2284_v15 }
0x17aa   :  { %v2291_v16 = vmul.f32 %v2289_v14, %v2283_v52 }
0x17ac   :  { %2832 = vmatprep.mubr.msk.f32.mxu1 %vm1160_vm5, %v2291_v16 }
0x17ad   :  { %2833 = vmatmul.mubr.msk.f32.vlgmr.msra.gmra.mrb[24].mxu1 %vm1160_vm5, %v2292_v17 }
0x1880   :  { %v2834_v25 = vpop.f32.mrb[24].mxu1 }
0x1881   :  { %v2375_v35 = vadd.f32 %v2834_v25, %v3453_v7  ;;  %v2365_v13 = vpop.f32.mrb[25].mxu1  ;;  %v2472_v7 = vrot.slane %v2386_v40, %v3144_v43 }
0x1882   :  { %v2374_v12 = vadd.f32 %v2365_v13, %v3455_v8 }
0x1883   :  { %v2381_v36 = vadd.f32 %v2379_v24, %v2375_v35 }
0x1884   :  { %v2380_v37 = vadd.f32 %v2379_v24, %v2374_v12 }
0x1885   :  { %v2393_v38 = vrot.slane %v2381_v36, 7 }
0x1887   :  { %v2395_v61 = vsel %vm2394_vm6, %v2393_v38, %v2380_v37 }
0x1888   :  { %2844 = vmatmul.mubr.msk.f32.vlgmr.msra.gmra.mrb[24].mxu0 %vm31_vm0, %v2395_v61 }
0x195b   :  { %v2464_v47 = vpop.f32.mrb[24].mxu0 }
0x195c   :  { %v2465_v11 = vadd.f32 %v2464_v47, %v2390_v39  ;;  %v2845_v44 = vpop.f32.mrb[25].mxu0 }
0x195e   :  { %v2468_v45 = vmax.f32 %v2465_v11, 0.0 }
0x1960   :  { %v2473_v8 = vmul.f32 %v2472_v7, %v2468_v45 }
0x1962   :  { %v2475_v0 = vsel %vm2474_vm7, %v2473_v8, 0.0 }
0x1963   :  { %2476 = vadd.xlane.f32.xlu1 %v2475_v0 }
0x19f0   :  { %v2477_v33 = vpop.xlane.xlu1 %2476 }
0x19f1   :  { %v2482_v46 = vadd.f32 %v2481_v55, %v2477_v33 }
0x19f3   :  { %v2483_v28 = vsub.f32 0.0, %v2482_v46 }
0x19f5   :  { %v2484_v31 = vmul.f32 1.442695, %v2483_v28 }
0x19f7   :  { %3019 = vpow2.f32 %v2484_v31 }
0x1a01   :  { %v3020_v48 = vpop.eup %3019 }
0x1a02   :  { %v2486_v49 = vadd.f32 1.0, %v3020_v48 }
0x1a04   :  { %3021 = vrcp.f32 %v2486_v49 }
0x1a0e   :  { %v3022_v41 = vpop.eup %3021 }
0x1a0f   :  { %2490 = vst.msk [vmem:[%s3542_s6] sm:$0x3] %vm2489_vm8, %v3022_v41 }

</bundles_post_ra>
